<compile_context>
chip_gen: v5e
topology: v5e:2x2
jax: 0.10.0
libtpu: 0.0.40
codegen_flags: <defaults>
</compile_context>

<pallas_src>
import math

import jax
import jax.numpy as jnp
from jax.experimental import pallas as pl
from jax.experimental.pallas import tpu as pltpu

HIDDEN = 50
NLAYERS = 9               # Linear(2,50) + 7x Linear(50,50) + Linear(50,2)
IN_W = 8                  # packed I/O lane width: [x0,y0,x1,y1,(x2,y2,x3,y3)]
LANE_STRIDE = 64          # lanes reserved per packed sample (50 used, 14 pad)
DEFAULT_BLOCK_ROWS = 2048  # packed rows per grid step


def _tpu_generation():
    """Best-effort TPU generation from the device kind string (default: 6)."""
    try:
        kind = jax.devices()[0].device_kind.lower()
    except Exception:
        return 6
    for g in (7, 6, 5, 4, 3, 2):
        if f"v{g}" in kind:
            return g
    return 6


def _round_up(n, m):
    return ((n + m - 1) // m) * m


def _make_kernel(n_hidden_layers, bf16_tanh):
    def kernel(dist_ref, xin_ref, wf_ref, wm_ref, wl_ref, bh_ref, bl_ref, out_ref):
        # dist_ref: SMEM (1,)          f32
        # xin_ref : (BR, 8)            f32  packed inputs
        # wf_ref  : (8, FPAD)          bf16 layer-0 weight (lane-packed copies of W1)
        # wm_ref  : (7, FPAD, FPAD)    bf16 block-diagonal hidden weights
        # wl_ref  : (FPAD, 8)          bf16 layer-8 weight
        # bh_ref  : (8, FPAD)          f32  biases of layers 0..7 (lane-packed)
        # bl_ref  : (1, 8)             f32  layer-8 bias (packed)
        # out_ref : (BR, 8)            f32  packed [X0, Y0, X1, Y1, ...]
        d = dist_ref[0]
        x8 = xin_ref[...]                                    # (BR, 8) f32

        def act(acc_f32):
            if bf16_tanh:
                # v6e/v7x: bf16 EUP tanh; next matmul consumes the bf16 directly.
                return jnp.tanh(acc_f32.astype(jnp.bfloat16))
            # v5e: f32 tanh (no bf16 EUP/VPU), cast afterwards for the MXU.
            return jnp.tanh(acc_f32).astype(jnp.bfloat16)

        h = act(jnp.dot(x8.astype(jnp.bfloat16), wf_ref[...],
                        preferred_element_type=jnp.float32) + bh_ref[0])
        for layer in range(n_hidden_layers):                 # 7 hidden layers, unrolled
            h = act(jnp.dot(h, wm_ref[layer],
                            preferred_element_type=jnp.float32) + bh_ref[layer + 1])
        u = (jnp.dot(h, wl_ref[...], preferred_element_type=jnp.float32)
             + bl_ref[...])
        # X = x + d * X_nn ; Y = y + d * Y_nn   (unused packed lanes stay exactly 0)
        out_ref[...] = x8 + d * u

    return kernel


def init_params(key):
    """Raw PyTorch-Linear-style params: list of (W: (fan_in, fan_out), b: (fan_out,))."""
    sizes = [(2, HIDDEN)] + [(HIDDEN, HIDDEN)] * 7 + [(HIDDEN, 2)]
    raw = []
    for fan_in, fan_out in sizes:
        key, kw, kb = jax.random.split(key, 3)
        bound = 1.0 / math.sqrt(fan_in)
        w = jax.random.uniform(kw, (fan_in, fan_out), jnp.float32, -bound, bound)
        b = jax.random.uniform(kb, (fan_out,), jnp.float32, -bound, bound)
        raw.append((w, b))
    return raw


def pack_params(raw, pack):
    """Lane-pack `pack` samples per vreg row (block-diagonal hidden weights)."""
    assert pack in (2, 4)
    fpad = LANE_STRIDE * pack
    (w1, b1) = raw[0]
    mids = raw[1:NLAYERS - 1]
    (w9, b9) = raw[NLAYERS - 1]

    wf = jnp.zeros((IN_W, fpad), jnp.float32)
    wm = jnp.zeros((NLAYERS - 2, fpad, fpad), jnp.float32)
    wl = jnp.zeros((fpad, IN_W), jnp.float32)
    bh = jnp.zeros((NLAYERS - 1, fpad), jnp.float32)
    bl = jnp.zeros((1, IN_W), jnp.float32)

    hid_bs = jnp.stack([b1] + [b for (_, b) in mids])        # (8, 50)
    for s in range(pack):
        lo = s * LANE_STRIDE
        wf = wf.at[2 * s:2 * s + 2, lo:lo + HIDDEN].set(w1)
        for i, (w, _) in enumerate(mids):
            wm = wm.at[i, lo:lo + HIDDEN, lo:lo + HIDDEN].set(w)
        wl = wl.at[lo:lo + HIDDEN, 2 * s:2 * s + 2].set(w9)
        bh = bh.at[:, lo:lo + HIDDEN].set(hid_bs)
        bl = bl.at[0, 2 * s:2 * s + 2].set(b9)

    # The residual add relies on the unused packed output lanes staying zero.
    if 2 * pack < IN_W:
        assert bool(jnp.all(wl[:, 2 * pack:] == 0.0))
        assert bool(jnp.all(bl[0, 2 * pack:] == 0.0))

    return (wf.astype(jnp.bfloat16), wm.astype(jnp.bfloat16),
            wl.astype(jnp.bfloat16), bh, bl)


def mesh_hard_bc_forward(x, y, packed, distance, *,
                         block_rows=DEFAULT_BLOCK_ROWS, generation=None):
    """x, y: (N, 1) float32. Returns (X, Y), each (N, 1) float32."""
    wf, wm, wl, bh, bl = packed
    fpad = wf.shape[1]
    pack = fpad // LANE_STRIDE
    if generation is None:
        generation = _tpu_generation()
    bf16_tanh = generation >= 6          # v5e EUP/VPU has no bf16

    N = x.shape[0]
    rows_needed = -(-N // pack)          # packed rows needed

    # Big tiles amortize ~0.35 us/step pipeline overhead; only shrink for small N.
    # On v7x keep >= 2 tiles for large batches so the "parallel" axis uses both TCs.
    min_tiles = 2 if (generation >= 7 and rows_needed >= 1024) else 1
    br = max(8, min(block_rows, _round_up(-(-rows_needed // min_tiles), 8)))

    samples_per_tile = pack * br
    n_pad = (-N) % samples_per_tile
    Np = N + n_pad
    rows = Np // pack
    num_tiles = rows // br

    upar = jnp.concatenate([x, y], axis=1).astype(jnp.float32)        # (N, 2)
    upar = jnp.pad(upar, ((0, n_pad), (0, 0)))                        # (Np, 2)
    # `pack` consecutive samples per row: [x0, y0, x1, y1, ...] (+ zero pad lanes).
    xin = jnp.pad(upar.reshape(rows, 2 * pack),
                  ((0, 0), (0, IN_W - 2 * pack)))                     # (rows, 8)

    dist = jnp.full((1,), distance, jnp.float32)

    flops = 2 * rows * (IN_W * fpad + (NLAYERS - 2) * fpad * fpad + fpad * IN_W)
    transcendentals = (NLAYERS - 1) * rows * fpad
    bytes_accessed = (2 * rows * IN_W * 4                             # xin + out (f32)
                      + (wf.size + wm.size + wl.size) * 2             # bf16 weights
                      + (bh.size + bl.size) * 4 + 4)

    kernel = _make_kernel(NLAYERS - 2, bf16_tanh)
    out = pl.pallas_call(
        kernel,
        out_shape=jax.ShapeDtypeStruct((rows, IN_W), jnp.float32),
        grid=(num_tiles,),
        in_specs=[
            pl.BlockSpec(memory_space=pltpu.MemorySpace.SMEM),               # distance
            pl.BlockSpec((br, IN_W), lambda i: (i, 0)),                      # xin
            pl.BlockSpec((IN_W, fpad), lambda i: (0, 0)),                    # wf
            pl.BlockSpec((NLAYERS - 2, fpad, fpad), lambda i: (0, 0, 0)),    # wm
            pl.BlockSpec((fpad, IN_W), lambda i: (0, 0)),                    # wl
            pl.BlockSpec((NLAYERS - 1, fpad), lambda i: (0, 0)),             # bh
            pl.BlockSpec((1, IN_W), lambda i: (0, 0)),                       # bl
        ],
        out_specs=pl.BlockSpec((br, IN_W), lambda i: (i, 0)),
        compiler_params=pltpu.CompilerParams(dimension_semantics=("parallel",)),
        cost_estimate=pl.CostEstimate(flops=flops,
                                      transcendentals=transcendentals,
                                      bytes_accessed=bytes_accessed),
    )(dist, xin, wf, wm, wl, bh, bl)

    res = out[:, :2 * pack].reshape(Np, 2)       # undo the lane packing
    return res[:N, 0:1], res[:N, 1:2]


def _reference_forward(x, y, raw, distance):
    """Pure-JAX f32 reference (same semantics as the PyTorch module)."""
    h = jnp.concatenate([x, y], axis=1)
    for i, (w, b) in enumerate(raw):
        h = h @ w + b
        if i < NLAYERS - 1:
            h = jnp.tanh(h)
    X = x + distance * h[:, 0:1]
    Y = y + distance * h[:, 1:2]
    return X, Y


if __name__ == "__main__":
    distance = 0.25
    generation = _tpu_generation()
    # 4 samples / 256 lanes fills the 2x256x256 MXU on v6e/v7x; v5e keeps 2/128.
    pack = 4 if generation >= 6 else 2

    raw = init_params(jax.random.PRNGKey(42))
    packed = pack_params(raw, pack)

    key = jax.random.PRNGKey(0)
    kx, ky = jax.random.split(key)
    N = 16
    x = jax.random.normal(kx, (N, 1), jnp.float32)
    y = jax.random.normal(ky, (N, 1), jnp.float32)

    X, Y = mesh_hard_bc_forward(x, y, packed, distance, generation=generation)
    jax.block_until_ready((X, Y))

    X_ref, Y_ref = _reference_forward(x, y, raw, distance)
    assert X.shape == (N, 1) and Y.shape == (N, 1)
    # bf16 matmuls / bf16 tanh (f32 accumulation) vs. f32 reference -> relaxed tol.
    assert jnp.allclose(X, X_ref, atol=2e-2, rtol=2e-2)
    assert jnp.allclose(Y, Y_ref, atol=2e-2, rtol=2e-2)

    # Second small check: N not a multiple of the packing factor (padding path).
    N2 = 13
    X2, Y2 = mesh_hard_bc_forward(x[:N2], y[:N2], packed, distance,
                                  generation=generation)
    jax.block_until_ready((X2, Y2))
    X2_ref, Y2_ref = _reference_forward(x[:N2], y[:N2], raw, distance)
    assert jnp.allclose(X2, X2_ref, atol=2e-2, rtol=2e-2)
    assert jnp.allclose(Y2, Y2_ref, atol=2e-2, rtol=2e-2)

    print("KERNEL_OK")
</pallas_src>

<mosaic_0001>
module attributes {stable_mosaic.version = 11 : i64} {
  func.func @kernel(%arg0: i32, %arg1: memref<1xf32, #tpu.memory_space<smem>>, %arg2: memref<8x8xf32, #tpu.memory_space<vmem>>, %arg3: memref<8x256xbf16, #tpu.memory_space<vmem>>, %arg4: memref<7x256x256xbf16, #tpu.memory_space<vmem>>, %arg5: memref<256x8xbf16, #tpu.memory_space<vmem>>, %arg6: memref<8x256xf32, #tpu.memory_space<vmem>>, %arg7: memref<1x8xf32, #tpu.memory_space<vmem>>, %arg8: memref<8x8xf32, #tpu.memory_space<vmem>>) attributes {dimension_semantics = [#tpu.dimension_semantics<parallel>], iteration_bounds = array<i64: 1>, scalar_prefetch = 0 : i64, scratch_operands = 0 : i64, tpu.core_type = #tpu.core_type<tc>, window_params = [{transform_indices = @transform_0, window_bounds = array<i64: 1>}, {transform_indices = @transform_1, window_bounds = array<i64: 8, 8>}, {pipeline_mode = #tpu.pipeline_mode<synchronous>, transform_indices = @transform_2, window_bounds = array<i64: 8, 256>}, {pipeline_mode = #tpu.pipeline_mode<synchronous>, transform_indices = @transform_3, window_bounds = array<i64: 7, 256, 256>}, {pipeline_mode = #tpu.pipeline_mode<synchronous>, transform_indices = @transform_4, window_bounds = array<i64: 256, 8>}, {pipeline_mode = #tpu.pipeline_mode<synchronous>, transform_indices = @transform_5, window_bounds = array<i64: 8, 256>}, {pipeline_mode = #tpu.pipeline_mode<synchronous>, transform_indices = @transform_6, window_bounds = array<i64: 1, 8>}, {transform_indices = @transform_7, window_bounds = array<i64: 8, 8>}]} {
    %c0 = arith.constant 0 : index
    %0 = memref.load %arg1[%c0] : memref<1xf32, #tpu.memory_space<smem>>
    %c0_0 = arith.constant 0 : index
    %c0_1 = arith.constant 0 : index
    %1 = vector.load %arg2[%c0_0, %c0_1] : memref<8x8xf32, #tpu.memory_space<vmem>>, vector<8x8xf32>
    %2 = arith.truncf %1 : vector<8x8xf32> to vector<8x8xbf16>
    %c0_2 = arith.constant 0 : index
    %c0_3 = arith.constant 0 : index
    %3 = vector.load %arg3[%c0_2, %c0_3] : memref<8x256xbf16, #tpu.memory_space<vmem>>, vector<8x256xbf16>
    %cst = arith.constant dense<0.000000e+00> : vector<8x256xf32>
    %4 = tpu.matmul %2, %3, %cst {dimension_numbers = #tpu.dot_dimension_numbers<[1], [0], [0], [1], [0, 0, 1, 1], [], []>} : vector<8x8xbf16>, vector<8x256xbf16>, vector<8x256xf32> -> vector<8x256xf32>
    %c0_4 = arith.constant 0 : index
    %c0_5 = arith.constant 0 : index
    %5 = vector.load %arg6[%c0_4, %c0_5] : memref<8x256xf32, #tpu.memory_space<vmem>>, vector<1x256xf32>
    %6 = vector.shape_cast %5 : vector<1x256xf32> to vector<256xf32>
    %7 = vector.shape_cast %6 : vector<256xf32> to vector<1x256xf32>
    %8 = vector.broadcast %7 : vector<1x256xf32> to vector<8x256xf32>
    %9 = arith.addf %4, %8 : vector<8x256xf32>
    %10 = arith.truncf %9 : vector<8x256xf32> to vector<8x256xbf16>
    %11 = math.tanh %10 : vector<8x256xbf16>
    %c0_6 = arith.constant 0 : index
    %c0_7 = arith.constant 0 : index
    %c0_8 = arith.constant 0 : index
    %12 = vector.load %arg4[%c0_6, %c0_7, %c0_8] : memref<7x256x256xbf16, #tpu.memory_space<vmem>>, vector<1x256x256xbf16>
    %13 = vector.shape_cast %12 : vector<1x256x256xbf16> to vector<256x256xbf16>
    %cst_9 = arith.constant dense<0.000000e+00> : vector<8x256xf32>
    %14 = tpu.matmul %11, %13, %cst_9 {dimension_numbers = #tpu.dot_dimension_numbers<[1], [0], [0], [1], [0, 0, 1, 1], [], []>} : vector<8x256xbf16>, vector<256x256xbf16>, vector<8x256xf32> -> vector<8x256xf32>
    %c1 = arith.constant 1 : index
    %c0_10 = arith.constant 0 : index
    %15 = vector.load %arg6[%c1, %c0_10] : memref<8x256xf32, #tpu.memory_space<vmem>>, vector<1x256xf32>
    %16 = vector.shape_cast %15 : vector<1x256xf32> to vector<256xf32>
    %17 = vector.shape_cast %16 : vector<256xf32> to vector<1x256xf32>
    %18 = vector.broadcast %17 : vector<1x256xf32> to vector<8x256xf32>
    %19 = arith.addf %14, %18 : vector<8x256xf32>
    %20 = arith.truncf %19 : vector<8x256xf32> to vector<8x256xbf16>
    %21 = math.tanh %20 : vector<8x256xbf16>
    %c1_11 = arith.constant 1 : index
    %c0_12 = arith.constant 0 : index
    %c0_13 = arith.constant 0 : index
    %22 = vector.load %arg4[%c1_11, %c0_12, %c0_13] : memref<7x256x256xbf16, #tpu.memory_space<vmem>>, vector<1x256x256xbf16>
    %23 = vector.shape_cast %22 : vector<1x256x256xbf16> to vector<256x256xbf16>
    %cst_14 = arith.constant dense<0.000000e+00> : vector<8x256xf32>
    %24 = tpu.matmul %21, %23, %cst_14 {dimension_numbers = #tpu.dot_dimension_numbers<[1], [0], [0], [1], [0, 0, 1, 1], [], []>} : vector<8x256xbf16>, vector<256x256xbf16>, vector<8x256xf32> -> vector<8x256xf32>
    %c2 = arith.constant 2 : index
    %c0_15 = arith.constant 0 : index
    %25 = vector.load %arg6[%c2, %c0_15] : memref<8x256xf32, #tpu.memory_space<vmem>>, vector<1x256xf32>
    %26 = vector.shape_cast %25 : vector<1x256xf32> to vector<256xf32>
    %27 = vector.shape_cast %26 : vector<256xf32> to vector<1x256xf32>
    %28 = vector.broadcast %27 : vector<1x256xf32> to vector<8x256xf32>
    %29 = arith.addf %24, %28 : vector<8x256xf32>
    %30 = arith.truncf %29 : vector<8x256xf32> to vector<8x256xbf16>
    %31 = math.tanh %30 : vector<8x256xbf16>
    %c2_16 = arith.constant 2 : index
    %c0_17 = arith.constant 0 : index
    %c0_18 = arith.constant 0 : index
    %32 = vector.load %arg4[%c2_16, %c0_17, %c0_18] : memref<7x256x256xbf16, #tpu.memory_space<vmem>>, vector<1x256x256xbf16>
    %33 = vector.shape_cast %32 : vector<1x256x256xbf16> to vector<256x256xbf16>
    %cst_19 = arith.constant dense<0.000000e+00> : vector<8x256xf32>
    %34 = tpu.matmul %31, %33, %cst_19 {dimension_numbers = #tpu.dot_dimension_numbers<[1], [0], [0], [1], [0, 0, 1, 1], [], []>} : vector<8x256xbf16>, vector<256x256xbf16>, vector<8x256xf32> -> vector<8x256xf32>
    %c3 = arith.constant 3 : index
    %c0_20 = arith.constant 0 : index
    %35 = vector.load %arg6[%c3, %c0_20] : memref<8x256xf32, #tpu.memory_space<vmem>>, vector<1x256xf32>
    %36 = vector.shape_cast %35 : vector<1x256xf32> to vector<256xf32>
    %37 = vector.shape_cast %36 : vector<256xf32> to vector<1x256xf32>
    %38 = vector.broadcast %37 : vector<1x256xf32> to vector<8x256xf32>
    %39 = arith.addf %34, %38 : vector<8x256xf32>
    %40 = arith.truncf %39 : vector<8x256xf32> to vector<8x256xbf16>
    %41 = math.tanh %40 : vector<8x256xbf16>
    %c3_21 = arith.constant 3 : index
    %c0_22 = arith.constant 0 : index
    %c0_23 = arith.constant 0 : index
    %42 = vector.load %arg4[%c3_21, %c0_22, %c0_23] : memref<7x256x256xbf16, #tpu.memory_space<vmem>>, vector<1x256x256xbf16>
    %43 = vector.shape_cast %42 : vector<1x256x256xbf16> to vector<256x256xbf16>
    %cst_24 = arith.constant dense<0.000000e+00> : vector<8x256xf32>
    %44 = tpu.matmul %41, %43, %cst_24 {dimension_numbers = #tpu.dot_dimension_numbers<[1], [0], [0], [1], [0, 0, 1, 1], [], []>} : vector<8x256xbf16>, vector<256x256xbf16>, vector<8x256xf32> -> vector<8x256xf32>
    %c4 = arith.constant 4 : index
    %c0_25 = arith.constant 0 : index
    %45 = vector.load %arg6[%c4, %c0_25] : memref<8x256xf32, #tpu.memory_space<vmem>>, vector<1x256xf32>
    %46 = vector.shape_cast %45 : vector<1x256xf32> to vector<256xf32>
    %47 = vector.shape_cast %46 : vector<256xf32> to vector<1x256xf32>
    %48 = vector.broadcast %47 : vector<1x256xf32> to vector<8x256xf32>
    %49 = arith.addf %44, %48 : vector<8x256xf32>
    %50 = arith.truncf %49 : vector<8x256xf32> to vector<8x256xbf16>
    %51 = math.tanh %50 : vector<8x256xbf16>
    %c4_26 = arith.constant 4 : index
    %c0_27 = arith.constant 0 : index
    %c0_28 = arith.constant 0 : index
    %52 = vector.load %arg4[%c4_26, %c0_27, %c0_28] : memref<7x256x256xbf16, #tpu.memory_space<vmem>>, vector<1x256x256xbf16>
    %53 = vector.shape_cast %52 : vector<1x256x256xbf16> to vector<256x256xbf16>
    %cst_29 = arith.constant dense<0.000000e+00> : vector<8x256xf32>
    %54 = tpu.matmul %51, %53, %cst_29 {dimension_numbers = #tpu.dot_dimension_numbers<[1], [0], [0], [1], [0, 0, 1, 1], [], []>} : vector<8x256xbf16>, vector<256x256xbf16>, vector<8x256xf32> -> vector<8x256xf32>
    %c5 = arith.constant 5 : index
    %c0_30 = arith.constant 0 : index
    %55 = vector.load %arg6[%c5, %c0_30] : memref<8x256xf32, #tpu.memory_space<vmem>>, vector<1x256xf32>
    %56 = vector.shape_cast %55 : vector<1x256xf32> to vector<256xf32>
    %57 = vector.shape_cast %56 : vector<256xf32> to vector<1x256xf32>
    %58 = vector.broadcast %57 : vector<1x256xf32> to vector<8x256xf32>
    %59 = arith.addf %54, %58 : vector<8x256xf32>
    %60 = arith.truncf %59 : vector<8x256xf32> to vector<8x256xbf16>
    %61 = math.tanh %60 : vector<8x256xbf16>
    %c5_31 = arith.constant 5 : index
    %c0_32 = arith.constant 0 : index
    %c0_33 = arith.constant 0 : index
    %62 = vector.load %arg4[%c5_31, %c0_32, %c0_33] : memref<7x256x256xbf16, #tpu.memory_space<vmem>>, vector<1x256x256xbf16>
    %63 = vector.shape_cast %62 : vector<1x256x256xbf16> to vector<256x256xbf16>
    %cst_34 = arith.constant dense<0.000000e+00> : vector<8x256xf32>
    %64 = tpu.matmul %61, %63, %cst_34 {dimension_numbers = #tpu.dot_dimension_numbers<[1], [0], [0], [1], [0, 0, 1, 1], [], []>} : vector<8x256xbf16>, vector<256x256xbf16>, vector<8x256xf32> -> vector<8x256xf32>
    %c6 = arith.constant 6 : index
    %c0_35 = arith.constant 0 : index
    %65 = vector.load %arg6[%c6, %c0_35] : memref<8x256xf32, #tpu.memory_space<vmem>>, vector<1x256xf32>
    %66 = vector.shape_cast %65 : vector<1x256xf32> to vector<256xf32>
    %67 = vector.shape_cast %66 : vector<256xf32> to vector<1x256xf32>
    %68 = vector.broadcast %67 : vector<1x256xf32> to vector<8x256xf32>
    %69 = arith.addf %64, %68 : vector<8x256xf32>
    %70 = arith.truncf %69 : vector<8x256xf32> to vector<8x256xbf16>
    %71 = math.tanh %70 : vector<8x256xbf16>
    %c6_36 = arith.constant 6 : index
    %c0_37 = arith.constant 0 : index
    %c0_38 = arith.constant 0 : index
    %72 = vector.load %arg4[%c6_36, %c0_37, %c0_38] : memref<7x256x256xbf16, #tpu.memory_space<vmem>>, vector<1x256x256xbf16>
    %73 = vector.shape_cast %72 : vector<1x256x256xbf16> to vector<256x256xbf16>
    %cst_39 = arith.constant dense<0.000000e+00> : vector<8x256xf32>
    %74 = tpu.matmul %71, %73, %cst_39 {dimension_numbers = #tpu.dot_dimension_numbers<[1], [0], [0], [1], [0, 0, 1, 1], [], []>} : vector<8x256xbf16>, vector<256x256xbf16>, vector<8x256xf32> -> vector<8x256xf32>
    %c7 = arith.constant 7 : index
    %c0_40 = arith.constant 0 : index
    %75 = vector.load %arg6[%c7, %c0_40] : memref<8x256xf32, #tpu.memory_space<vmem>>, vector<1x256xf32>
    %76 = vector.shape_cast %75 : vector<1x256xf32> to vector<256xf32>
    %77 = vector.shape_cast %76 : vector<256xf32> to vector<1x256xf32>
    %78 = vector.broadcast %77 : vector<1x256xf32> to vector<8x256xf32>
    %79 = arith.addf %74, %78 : vector<8x256xf32>
    %80 = arith.truncf %79 : vector<8x256xf32> to vector<8x256xbf16>
    %81 = math.tanh %80 : vector<8x256xbf16>
    %c0_41 = arith.constant 0 : index
    %c0_42 = arith.constant 0 : index
    %82 = vector.load %arg5[%c0_41, %c0_42] : memref<256x8xbf16, #tpu.memory_space<vmem>>, vector<256x8xbf16>
    %cst_43 = arith.constant dense<0.000000e+00> : vector<8x8xf32>
    %83 = tpu.matmul %81, %82, %cst_43 {dimension_numbers = #tpu.dot_dimension_numbers<[1], [0], [0], [1], [0, 0, 1, 1], [], []>} : vector<8x256xbf16>, vector<256x8xbf16>, vector<8x8xf32> -> vector<8x8xf32>
    %c0_44 = arith.constant 0 : index
    %c0_45 = arith.constant 0 : index
    %84 = vector.load %arg7[%c0_44, %c0_45] : memref<1x8xf32, #tpu.memory_space<vmem>>, vector<1x8xf32>
    %85 = vector.broadcast %84 : vector<1x8xf32> to vector<8x8xf32>
    %86 = arith.addf %83, %85 : vector<8x8xf32>
    %87 = vector.broadcast %0 : f32 to vector<8x8xf32>
    %88 = arith.mulf %87, %86 : vector<8x8xf32>
    %89 = arith.addf %1, %88 : vector<8x8xf32>
    %c0_46 = arith.constant 0 : index
    %c0_47 = arith.constant 0 : index
    %90 = vector.load %arg8[%c0_46, %c0_47] : memref<8x8xf32, #tpu.memory_space<vmem>>, vector<8x8xf32>
    tpu.vector_store %arg8[%c0_46, %c0_47], %89 {strides = array<i32>} : memref<8x8xf32, #tpu.memory_space<vmem>>, vector<8x8xf32>,
    return
  }
  func.func @transform_0(%arg0: i32) -> i32 {
    %c0_i32 = arith.constant 0 : i32
    %c0_i32_0 = arith.constant 0 : i32
    return %c0_i32 : i32
  }
  func.func @transform_1(%arg0: i32) -> (i32, i32) {
    %c0_i32 = arith.constant 0 : i32
    %c0_i32_0 = arith.constant 0 : i32
    return %arg0, %c0_i32 : i32, i32
  }
  func.func @transform_2(%arg0: i32) -> (i32, i32) {
    %c0_i32 = arith.constant 0 : i32
    %c0_i32_0 = arith.constant 0 : i32
    %c0_i32_1 = arith.constant 0 : i32
    return %c0_i32, %c0_i32_0 : i32, i32
  }
  func.func @transform_3(%arg0: i32) -> (i32, i32, i32) {
    %c0_i32 = arith.constant 0 : i32
    %c0_i32_0 = arith.constant 0 : i32
    %c0_i32_1 = arith.constant 0 : i32
    %c0_i32_2 = arith.constant 0 : i32
    return %c0_i32, %c0_i32_0, %c0_i32_1 : i32, i32, i32
  }
  func.func @transform_4(%arg0: i32) -> (i32, i32) {
    %c0_i32 = arith.constant 0 : i32
    %c0_i32_0 = arith.constant 0 : i32
    %c0_i32_1 = arith.constant 0 : i32
    return %c0_i32, %c0_i32_0 : i32, i32
  }
  func.func @transform_5(%arg0: i32) -> (i32, i32) {
    %c0_i32 = arith.constant 0 : i32
    %c0_i32_0 = arith.constant 0 : i32
    %c0_i32_1 = arith.constant 0 : i32
    return %c0_i32, %c0_i32_0 : i32, i32
  }
  func.func @transform_6(%arg0: i32) -> (i32, i32) {
    %c0_i32 = arith.constant 0 : i32
    %c0_i32_0 = arith.constant 0 : i32
    %c0_i32_1 = arith.constant 0 : i32
    return %c0_i32, %c0_i32_0 : i32, i32
  }
  func.func @transform_7(%arg0: i32) -> (i32, i32) {
    %c0_i32 = arith.constant 0 : i32
    %c0_i32_0 = arith.constant 0 : i32
    return %arg0, %c0_i32 : i32, i32
  }
}

</mosaic_0001>

<bundles_post_ra>
// kernel: tpu_custom_call.1
= control target key start
LH: loop header
LB: loop body
LE: loop exit
PB: predicated region body
PF: predicated region fallthrough
CT: control target
= control target key end

     0   :  { %13 = vsyncpa [#allocation4], 0  ;;  %s3544_s0 = inlined_call_operand.<no memory space> [shape: f32[1], index: 0, kind: input, shape index: {}]   ;;  %s3545_s1 = inlined_call_operand.vmem [shape: f32[8,8], index: 1, kind: input, shape index: {}]   ;;  %s3546_s2 = inlined_call_operand.vmem [shape: bf16[8,256], index: 2, kind: input, shape index: {}]   ;;  %s3547_s3 = inlined_call_operand.hbm [shape: bf16[7,256,256], index: 3, kind: input, shape index: {}]   ;;  %s3548_s4 = inlined_call_operand.vmem [shape: bf16[256,8], index: 4, kind: input, shape index: {}]   ;;  %s3549_s5 = inlined_call_operand.vmem [shape: f32[8,256], index: 5, kind: input, shape index: {}]   ;;  %s3550_s6 = inlined_call_operand.vmem [shape: f32[1,8], index: 6, kind: input, shape index: {}]   ;;  %s3551_s7 = inlined_call_operand.hbm [shape: f32[8,8], index: 7, kind: output, shape index: {}]  }
   0x1   :  { %14 = vsyncpa [#allocation5], 0  ;;  %s25_s26 = sshll.u32 %s3547_s3, 4  ;;  %s3402_s27 = smov [#allocation3]   ;;  %s26_s26 = int_to_ptr.hbm [resolvable:$true] %s25_s26 }
   0x2   :  { %s27_s28 = sshll.u32 %s3402_s27, 4  ;;  %s3403_s29 = smov 128   ;;  %s28_s28 = int_to_ptr.vmem [resolvable:$true] %s27_s28 }
   0x3   :  { %s3404_s30 = smov 8  }
   0x4   :  { %33 = dma.hbm_to_vmem [thread:$0]  %s26_s26, 28672, %s28_s28, [#allocation4], %s3403_s29, %s3403_s29, %s3404_s30  }
   0x5   :  { %3398 = dma.done.wait [#allocation4], 28672  }
   0x6   :  { %3399 = vsyncadd [#allocation4], 4294938624  ;;  %v48_v0 = vld [vmem:[%s3546_s2] sm:$0xff]  ;;  %vm64_vm0 = vcmask 1043456   ;;  %vm60_vm1 = vcmask 64512   ;;  %s3405_s2 = smov [#allocation6]  }
   0x7   :  { %v46_v1 = vld [vmem:[%s3545_s1] sm:$0xff]  ;;  %v2164_v2 = vld [vmem:[#allocation3 + $0x70] sm:$0xf]  ;;  %v56_v3 = vunpack.c.l.b16 %v48_v0  ;;  %v57_v4 = vunpack.c.h.b16 %v48_v0  ;;  %v3087_v5 = vld [vmem:[#allocation3 + $0x74] sm:$0xf0]  ;;  %s2091_s3 = sshll.u32 %s3405_s2, 4  ;;  %s2092_s3 = int_to_ptr.vmem [resolvable:$true] %s2091_s3 }
   0x8   :  { %v2228_v6 = vld [vmem:[#allocation3 + $0xf0] sm:$0xf]  ;;  %v3103_v7 = vld [vmem:[#allocation3 + $0xf4] sm:$0xf0]  ;;  %v2165_v8 = vor.u32 %v3087_v5, %v2164_v2  ;;  %v3086_v10 = vld [vmem:[#allocation3 + $0x74] sm:$0xf]  ;;  %v47_v26 = vpack.c.bf16 %v46_v1, %v46_v1 }
   0x9   :  { %v2229_v9 = vor.u32 %v3103_v7, %v2228_v6  ;;  %v2166_v11 = vld [vmem:[#allocation3 + $0x78] sm:$0xf0]  ;;  %v3102_v12 = vld [vmem:[#allocation3 + $0xf4] sm:$0xf]  ;;  %v58_v13 = vpack.c.b16 %v56_v3, %v56_v3  ;;  %v59_v14 = vpack.c.b16 %v57_v4, %v57_v4  ;;  %v2156_v17 = vld [vmem:[#allocation3 + $0x60] sm:$0xf] }
   0xa   :  { %v2169_v15 = vor.u32 %v3086_v10, %v2166_v11  ;;  %v2230_v16 = vld [vmem:[#allocation3 + $0xf8] sm:$0xf0]  ;;  %v3085_v18 = vld [vmem:[#allocation3 + $0x64] sm:$0xf0]  ;;  %304 = vmatpush.bf16.msra.mxu2 %v2165_v8  ;;  %v2220_v21 = vld [vmem:[#allocation3 + $0xe0] sm:$0xf] }
   0xb   :  { %317 = vmatpush.bf16.msra.mxu3 %v2229_v9  ;;  %v2233_v19 = vor.u32 %v3102_v12, %v2230_v16  ;;  %v2157_v20 = vor.u32 %v3085_v18, %v2156_v17  ;;  %v3101_v22 = vld [vmem:[#allocation3 + $0xe4] sm:$0xf0]  ;;  %v3084_v23 = vld [vmem:[#allocation3 + $0x64] sm:$0xf]  ;;  %v66_v24 = vsel %vm64_vm0, %v58_v13, 0  ;;  %v69_v25 = vsel %vm64_vm0, %v59_v14, 0 }
   0xc   :  { %v2221_v27 = vor.u32 %v3101_v22, %v2220_v21  ;;  %v2158_v28 = vld [vmem:[#allocation3 + $0x68] sm:$0xf0]  ;;  %v3100_v29 = vld [vmem:[#allocation3 + $0xe4] sm:$0xf]  ;;  %78 = vmatpush.bf16.msra.mxu0 %v66_v24  ;;  %91 = vmatpush.bf16.msra.mxu1 %v69_v25  ;;  %v2148_v31 = vld [vmem:[#allocation3 + $0x50] sm:$0xf] }
   0xd   :  { %v2222_v30 = vld [vmem:[#allocation3 + $0xe8] sm:$0xf0]  ;;  %v3083_v32 = vld [vmem:[#allocation3 + $0x54] sm:$0xf0]  ;;  %v2161_v33 = vor.u32 %v3084_v23, %v2158_v28  ;;  %v2212_v35 = vld [vmem:[#allocation3 + $0xd0] sm:$0xf] }
   0xe   :  { %v2225_v34 = vor.u32 %v3100_v29, %v2222_v30  ;;  %v3099_v36 = vld [vmem:[#allocation3 + $0xd4] sm:$0xf0]  ;;  %v3082_v37 = vld [vmem:[#allocation3 + $0x54] sm:$0xf]  ;;  %305 = vmatpush.bf16.msra.mxu2 %v2157_v20  ;;  %v2149_v38 = vor.u32 %v3083_v32, %v2148_v31  ;;  %v2150_v40 = vld [vmem:[#allocation3 + $0x58] sm:$0xf0] }
   0xf   :  { %318 = vmatpush.bf16.msra.mxu3 %v2221_v27  ;;  %v2213_v39 = vor.u32 %v3099_v36, %v2212_v35  ;;  %v3098_v41 = vld [vmem:[#allocation3 + $0xd4] sm:$0xf]  ;;  %v2214_v42 = vld [vmem:[#allocation3 + $0xd8] sm:$0xf0]  ;;  %2103 = vmatmul.msk.bf16.vlgmr.msra.gmra.mxu0 %vm60_vm1, %v47_v26  ;;  %v2140_v43 = vld [vmem:[#allocation3 + $0x40] sm:$0xf]  ;;  %v2153_v47 = vor.u32 %v3082_v37, %v2150_v40 }
  0x10   :  { %330 = vmatpush.bf16.msrb.mxu0 %v2169_v15  ;;  %343 = vmatpush.bf16.msrb.mxu1 %v2233_v19  ;;  %v3081_v44 = vld [vmem:[#allocation3 + $0x44] sm:$0xf0]  ;;  %v2204_v45 = vld [vmem:[#allocation3 + $0xc0] sm:$0xf]  ;;  %v2217_v48 = vor.u32 %v3098_v41, %v2214_v42  ;;  %v3080_v49 = vld [vmem:[#allocation3 + $0x44] sm:$0xf] }
  0x11   :  { %2104 = vmatmul.msk.bf16.vlgmr.msra.gmra.mxu1 %vm60_vm1, %v47_v26  ;;  %v3097_v46 = vld [vmem:[#allocation3 + $0xc4] sm:$0xf0]  ;;  %v2141_v50 = vor.u32 %v3081_v44, %v2140_v43  ;;  %v2142_v52 = vld [vmem:[#allocation3 + $0x48] sm:$0xf0]  ;;  %v3096_v53 = vld [vmem:[#allocation3 + $0xc4] sm:$0xf] }
  0x12   :  { %306 = vmatpush.bf16.msra.mxu2 %v2149_v38  ;;  %v2205_v51 = vor.u32 %v3097_v46, %v2204_v45  ;;  %v2206_v54 = vld [vmem:[#allocation3 + $0xc8] sm:$0xf0]  ;;  %v2145_v55 = vor.u32 %v3080_v49, %v2142_v52  ;;  %v2132_v57 = vld [vmem:[#allocation3 + $0x30] sm:$0xf]  ;;  %v3079_v58 = vld [vmem:[#allocation3 + $0x34] sm:$0xf0] }
  0x13   :  { %319 = vmatpush.bf16.msra.mxu3 %v2213_v39  ;;  %v2209_v56 = vor.u32 %v3096_v53, %v2206_v54  ;;  %v2133_v59 = vor.u32 %v3079_v58, %v2132_v57  ;;  %v2196_v60 = vld [vmem:[#allocation3 + $0xb0] sm:$0xf]  ;;  %v3095_v61 = vld [vmem:[#allocation3 + $0xb4] sm:$0xf0]  ;;  %v3078_v62 = vld [vmem:[#allocation3 + $0x34] sm:$0xf] }
  0x14   :  { %331 = vmatpush.bf16.msrb.mxu0 %v2161_v33  ;;  %344 = vmatpush.bf16.msrb.mxu1 %v2225_v34  ;;  %v2197_v63 = vor.u32 %v3095_v61, %v2196_v60  ;;  %v2134_v0 = vld [vmem:[#allocation3 + $0x38] sm:$0xf0]  ;;  %v3094_v1 = vld [vmem:[#allocation3 + $0xb4] sm:$0xf]  ;;  %v2124_v5 = vld [vmem:[#allocation3 + $0x20] sm:$0xf] }
  0x15   :  { %v2198_v2 = vld [vmem:[#allocation3 + $0xb8] sm:$0xf0]  ;;  %v2137_v3 = vor.u32 %v3078_v62, %v2134_v0  ;;  %v3077_v6 = vld [vmem:[#allocation3 + $0x24] sm:$0xf0]  ;;  %v2188_v7 = vld [vmem:[#allocation3 + $0xa0] sm:$0xf] }
  0x16   :  { %307 = vmatpush.bf16.msra.mxu2 %v2141_v50  ;;  %v2201_v4 = vor.u32 %v3094_v1, %v2198_v2  ;;  %v2125_v8 = vor.u32 %v3077_v6, %v2124_v5  ;;  %v3093_v9 = vld [vmem:[#allocation3 + $0xa4] sm:$0xf0]  ;;  %v3076_v10 = vld [vmem:[#allocation3 + $0x24] sm:$0xf]  ;;  %v2126_v11 = vld [vmem:[#allocation3 + $0x28] sm:$0xf0] }
  0x17   :  { %320 = vmatpush.bf16.msra.mxu3 %v2205_v51  ;;  %v2189_v12 = vor.u32 %v3093_v9, %v2188_v7  ;;  %v2129_v13 = vor.u32 %v3076_v10, %v2126_v11  ;;  %v3092_v14 = vld [vmem:[#allocation3 + $0xa4] sm:$0xf]  ;;  %v2190_v15 = vld [vmem:[#allocation3 + $0xa8] sm:$0xf0]  ;;  %v2116_v17 = vld [vmem:[#allocation3 + $0x10] sm:$0xf] }
  0x18   :  { %332 = vmatpush.bf16.msrb.mxu0 %v2153_v47  ;;  %345 = vmatpush.bf16.msrb.mxu1 %v2217_v48  ;;  %v2193_v16 = vor.u32 %v3092_v14, %v2190_v15  ;;  %v3075_v18 = vld [vmem:[#allocation3 + $0x14] sm:$0xf0]  ;;  %v2180_v19 = vld [vmem:[#allocation3 + $0x90] sm:$0xf]  ;;  %v3074_v22 = vld [vmem:[#allocation3 + $0x14] sm:$0xf] }
  0x19   :  { %v2117_v20 = vor.u32 %v3075_v18, %v2116_v17  ;;  %v3091_v21 = vld [vmem:[#allocation3 + $0x94] sm:$0xf0]  ;;  %v2118_v23 = vld [vmem:[#allocation3 + $0x18] sm:$0xf0]  ;;  %v3090_v26 = vld [vmem:[#allocation3 + $0x94] sm:$0xf] }
  0x1a   :  { %308 = vmatpush.bf16.msra.mxu2 %v2133_v59  ;;  %v2181_v24 = vor.u32 %v3091_v21, %v2180_v19  ;;  %v2121_v25 = vor.u32 %v3074_v22, %v2118_v23  ;;  %v2182_v27 = vld [vmem:[#allocation3 + $0x98] sm:$0xf0]  ;;  %v2108_v28 = vld [vmem:[#allocation3] sm:$0xf]  ;;  %v3073_v30 = vld [vmem:[#allocation3 + $0x4] sm:$0xf0] }
  0x1b   :  { %321 = vmatpush.bf16.msra.mxu3 %v2197_v63  ;;  %v2185_v29 = vor.u32 %v3090_v26, %v2182_v27  ;;  %v2172_v31 = vld [vmem:[#allocation3 + $0x80] sm:$0xf]  ;;  %v3089_v32 = vld [vmem:[#allocation3 + $0x84] sm:$0xf0]  ;;  %v2109_v33 = vor.u32 %v3073_v30, %v2108_v28  ;;  %v3072_v35 = vld [vmem:[#allocation3 + $0x4] sm:$0xf] }
  0x1c   :  { %333 = vmatpush.bf16.msrb.mxu0 %v2145_v55  ;;  %346 = vmatpush.bf16.msrb.mxu1 %v2209_v56  ;;  %v2173_v34 = vor.u32 %v3089_v32, %v2172_v31  ;;  %v2110_v36 = vld [vmem:[#allocation3 + $0x8] sm:$0xf0]  ;;  %v3088_v37 = vld [vmem:[#allocation3 + $0x84] sm:$0xf]  ;;  %v2357_v41 = vld [vmem:[#allocation3 + $0x1f0] sm:$0xf] }
  0x1d   :  { %v2113_v38 = vor.u32 %v3072_v35, %v2110_v36  ;;  %v2174_v39 = vld [vmem:[#allocation3 + $0x88] sm:$0xf0]  ;;  %v3135_v42 = vld [vmem:[#allocation3 + $0x1f4] sm:$0xf0]  ;;  %v3134_v43 = vld [vmem:[#allocation3 + $0x1f4] sm:$0xf] }
  0x1e   :  { %309 = vmatpush.bf16.msra.mxu2 %v2125_v8  ;;  %v2177_v40 = vor.u32 %v3088_v37, %v2174_v39  ;;  %v2358_v44 = vor.u32 %v3135_v42, %v2357_v41  ;;  %v2359_v45 = vld [vmem:[#allocation3 + $0x1f8] sm:$0xf0]  ;;  %v2349_v46 = vld [vmem:[#allocation3 + $0x1e0] sm:$0xf]  ;;  %v3133_v47 = vld [vmem:[#allocation3 + $0x1e4] sm:$0xf0] }
  0x1f   :  { %322 = vmatpush.bf16.msra.mxu3 %v2189_v12  ;;  %v2362_v48 = vor.u32 %v3134_v43, %v2359_v45  ;;  %v3132_v49 = vld [vmem:[#allocation3 + $0x1e4] sm:$0xf]  ;;  %v2351_v50 = vld [vmem:[#allocation3 + $0x1e8] sm:$0xf0]  ;;  %v2293_v51 = vld [vmem:[#allocation3 + $0x170] sm:$0xf]  ;;  %v2350_v52 = vor.u32 %v3133_v47, %v2349_v46 }
  0x20   :  { %334 = vmatpush.bf16.msrb.mxu0 %v2137_v3  ;;  %347 = vmatpush.bf16.msrb.mxu1 %v2201_v4  ;;  %v3119_v53 = vld [vmem:[#allocation3 + $0x174] sm:$0xf0]  ;;  %v3118_v54 = vld [vmem:[#allocation3 + $0x174] sm:$0xf]  ;;  %v2295_v55 = vld [vmem:[#allocation3 + $0x178] sm:$0xf0]  ;;  %v2354_v56 = vor.u32 %v3132_v49, %v2351_v50 }
  0x21   :  { %v2294_v57 = vor.u32 %v3119_v53, %v2293_v51  ;;  %v2298_v58 = vor.u32 %v3118_v54, %v2295_v55  ;;  %v2341_v59 = vld [vmem:[#allocation3 + $0x1d0] sm:$0xf]  ;;  %v3131_v60 = vld [vmem:[#allocation3 + $0x1d4] sm:$0xf0]  ;;  %v3130_v61 = vld [vmem:[#allocation3 + $0x1d4] sm:$0xf] }
  0x22   :  { %310 = vmatpush.bf16.msra.mxu2 %v2117_v20  ;;  %v2343_v62 = vld [vmem:[#allocation3 + $0x1d8] sm:$0xf0]  ;;  %v2285_v63 = vld [vmem:[#allocation3 + $0x160] sm:$0xf]  ;;  %v3117_v0 = vld [vmem:[#allocation3 + $0x164] sm:$0xf0]  ;;  %v2342_v5 = vor.u32 %v3131_v60, %v2341_v59 }
  0x23   :  { %323 = vmatpush.bf16.msra.mxu3 %v2181_v24  ;;  %v2286_v1 = vor.u32 %v3117_v0, %v2285_v63  ;;  %v3116_v2 = vld [vmem:[#allocation3 + $0x164] sm:$0xf]  ;;  %v2287_v3 = vld [vmem:[#allocation3 + $0x168] sm:$0xf0]  ;;  %v2346_v7 = vor.u32 %v3130_v61, %v2343_v62  ;;  %v2333_v8 = vld [vmem:[#allocation3 + $0x1c0] sm:$0xf] }
  0x24   :  { %335 = vmatpush.bf16.msrb.mxu0 %v2129_v13  ;;  %348 = vmatpush.bf16.msrb.mxu1 %v2193_v16  ;;  %v49_v4 = vld [vmem:[%s3549_s5] ss:$8 sm:$0x3]  ;;  %v2290_v6 = vor.u32 %v3116_v2, %v2287_v3  ;;  %v3128_v10 = vld [vmem:[#allocation3 + $0x1c4] sm:$0xf]  ;;  %s2093_s14 = sshll.u32 %s3551_s7, 4  ;;  %s2094_s14 = int_to_ptr.hbm [resolvable:$true] %s2093_s14 }
  0x25   :  { %v3129_v9 = vld [vmem:[#allocation3 + $0x1c4] sm:$0xf0]  ;;  %v2335_v11 = vld [vmem:[#allocation3 + $0x1c8] sm:$0xf0]  ;;  %v51_v13 = vperm.slane %v49_v4, 0  ;;  %v52_v14 = vperm.slane %v49_v4, 1 }
  0x26   :  { %311 = vmatpush.bf16.msra.mxu2 %v2109_v33  ;;  %v2334_v12 = vor.u32 %v3129_v9, %v2333_v8  ;;  %v2338_v15 = vor.u32 %v3128_v10, %v2335_v11  ;;  %v2277_v30 = vld [vmem:[#allocation3 + $0x150] sm:$0xf]  ;;  %v3115_v31 = vld [vmem:[#allocation3 + $0x154] sm:$0xf0]  ;;  %v3114_v32 = vld [vmem:[#allocation3 + $0x154] sm:$0xf] }
  0x27   :  { %324 = vmatpush.bf16.msra.mxu3 %v2173_v34  ;;  %v2278_v33 = vor.u32 %v3115_v31, %v2277_v30  ;;  %v2279_v34 = vld [vmem:[#allocation3 + $0x158] sm:$0xf0]  ;;  %v2325_v36 = vld [vmem:[#allocation3 + $0x1b0] sm:$0xf]  ;;  %v3127_v37 = vld [vmem:[#allocation3 + $0x1b4] sm:$0xf0] }
  0x28   :  { %336 = vmatpush.bf16.msrb.mxu0 %v2121_v25  ;;  %349 = vmatpush.bf16.msrb.mxu1 %v2185_v29  ;;  %v2282_v35 = vor.u32 %v3114_v32, %v2279_v34  ;;  %v2326_v39 = vor.u32 %v3127_v37, %v2325_v36  ;;  %v2269_v42 = vld [vmem:[#allocation3 + $0x140] sm:$0xf]  ;;  %v3113_v43 = vld [vmem:[#allocation3 + $0x144] sm:$0xf0]  ;;  %v2271_v46 = vld [vmem:[#allocation3 + $0x148] sm:$0xf0] }
  0x29   :  { %v2270_v45 = vor.u32 %v3113_v43, %v2269_v42  ;;  %v3125_v49 = vld [vmem:[#allocation3 + $0x1a4] sm:$0xf0]  ;;  %v3124_v50 = vld [vmem:[#allocation3 + $0x1a4] sm:$0xf]  ;;  %v2261_v54 = vld [vmem:[#allocation3 + $0x130] sm:$0xf] }
  0x2a   :  { %564 = vmatpush.bf16.msrb.mxu2 %v2294_v57  ;;  %v3111_v55 = vld [vmem:[#allocation3 + $0x134] sm:$0xf0]  ;;  %v2309_v60 = vld [vmem:[#allocation3 + $0x190] sm:$0xf]  ;;  %v3122_v62 = vld [vmem:[#allocation3 + $0x194] sm:$0xf] }
  0x2b   :  { %577 = vmatpush.bf16.msrb.mxu3 %v2358_v44  ;;  %v3112_v44 = vld [vmem:[#allocation3 + $0x144] sm:$0xf]  ;;  %v2262_v57 = vor.u32 %v3111_v55, %v2261_v54  ;;  %v3123_v61 = vld [vmem:[#allocation3 + $0x194] sm:$0xf0]  ;;  %v2311_v0 = vld [vmem:[#allocation3 + $0x198] sm:$0xf0] }
  0x2c   :  { %337 = vmatpush.bf16.msrb.mxu0 %v2113_v38  ;;  %350 = vmatpush.bf16.msrb.mxu1 %v2177_v40  ;;  %v3126_v38 = vld [vmem:[#allocation3 + $0x1b4] sm:$0xf]  ;;  %v2327_v40 = vld [vmem:[#allocation3 + $0x1b8] sm:$0xf0]  ;;  %v2274_v47 = vor.u32 %v3112_v44, %v2271_v46  ;;  %v2310_v63 = vor.u32 %v3123_v61, %v2309_v60  ;;  %v2253_v2 = vld [vmem:[#allocation3 + $0x120] sm:$0xf] }
  0x2d   :  { %v2330_v41 = vor.u32 %v3126_v38, %v2327_v40  ;;  %v3109_v3 = vld [vmem:[#allocation3 + $0x124] sm:$0xf0]  ;;  %v3108_v4 = vld [vmem:[#allocation3 + $0x124] sm:$0xf]  ;;  %v2301_v8 = vld [vmem:[#allocation3 + $0x180] sm:$0xf] }
  0x2e   :  { %565 = vmatpush.bf16.msrb.mxu2 %v2286_v1  ;;  %v2314_v1 = vor.u32 %v3122_v62, %v2311_v0  ;;  %v3121_v9 = vld [vmem:[#allocation3 + $0x184] sm:$0xf0]  ;;  %v3120_v10 = vld [vmem:[#allocation3 + $0x184] sm:$0xf]  ;;  %v2488_v31 = vld [vmem:[#allocation3 + $0x2f8] sm:$0xf0] }
  0x2f   :  { %578 = vmatpush.bf16.msrb.mxu3 %v2350_v52  ;;  %v2319_v52 = vld [vmem:[#allocation3 + $0x1a8] sm:$0xf0]  ;;  %v2302_v11 = vor.u32 %v3121_v9, %v2301_v8  ;;  %v2478_v32 = vld [vmem:[#allocation3 + $0x2e0] sm:$0xf]  ;;  %v2422_v37 = vld [vmem:[#allocation3 + $0x270] sm:$0xf] }
  0x30   :  { %603 = vmatpush.bf16.msra.mxu1 %v2362_v48  ;;  %590 = vmatpush.bf16.msra.mxu0 %v2298_v58  ;;  %v2317_v48 = vld [vmem:[#allocation3 + $0x1a0] sm:$0xf]  ;;  %v2322_v53 = vor.u32 %v3124_v50, %v2319_v52  ;;  %v2263_v58 = vld [vmem:[#allocation3 + $0x138] sm:$0xf0]  ;;  %v2480_v36 = vld [vmem:[#allocation3 + $0x2e8] sm:$0xf0] }
  0x31   :  { %v2318_v51 = vor.u32 %v3125_v49, %v2317_v48  ;;  %v3150_v40 = vld [vmem:[#allocation3 + $0x274] sm:$0xf]  ;;  %v2414_v8 = vld [vmem:[#allocation3 + $0x260] sm:$0xf]  ;;  %v3149_v9 = vld [vmem:[#allocation3 + $0x264] sm:$0xf0] }
  0x32   :  { %566 = vmatpush.bf16.msrb.mxu2 %v2278_v33  ;;  %v3165_v33 = vld [vmem:[#allocation3 + $0x2e4] sm:$0xf0] }
  0x33   :  { %579 = vmatpush.bf16.msrb.mxu3 %v2342_v5  ;;  %v2254_v5 = vor.u32 %v3109_v3, %v2253_v2  ;;  %v2479_v38 = vor.u32 %v3165_v33, %v2478_v32  ;;  %v2470_v3 = vld [vmem:[#allocation3 + $0x2d0] sm:$0xf]  ;;  %v2398_v33 = vld [vmem:[#allocation3 + $0x240] sm:$0xf] }
  0x34   :  { %604 = vmatpush.bf16.msra.mxu1 %v2354_v56  ;;  %591 = vmatpush.bf16.msra.mxu0 %v2290_v6  ;;  %v3110_v56 = vld [vmem:[#allocation3 + $0x134] sm:$0xf]  ;;  %v2255_v6 = vld [vmem:[#allocation3 + $0x128] sm:$0xf0] }
  0x35   :  { %v2266_v59 = vor.u32 %v3110_v56, %v2263_v58 }
  0x36   :  { %567 = vmatpush.bf16.msrb.mxu2 %v2270_v45 }
  0x37   :  { %580 = vmatpush.bf16.msrb.mxu3 %v2334_v12  ;;  %v2303_v12 = vld [vmem:[#allocation3 + $0x188] sm:$0xf0] }
  0x38   :  { %605 = vmatpush.bf16.msra.mxu1 %v2346_v7  ;;  %592 = vmatpush.bf16.msra.mxu0 %v2282_v35  ;;  %v2258_v7 = vor.u32 %v3108_v4, %v2255_v6  ;;  %v3164_v35 = vld [vmem:[#allocation3 + $0x2e4] sm:$0xf]  ;;  %v3163_v4 = vld [vmem:[#allocation3 + $0x2d4] sm:$0xf0] }
  0x39   :  { %v2483_v42 = vor.u32 %v3164_v35, %v2480_v36  ;;  %v2471_v6 = vor.u32 %v3163_v4, %v2470_v3  ;;  %v3144_v35 = vld [vmem:[#allocation3 + $0x244] sm:$0xf]  ;;  %v2432_v3 = vld [vmem:[#allocation3 + $0x288] sm:$0xf0] }
  0x3a   :  { %568 = vmatpush.bf16.msrb.mxu2 %v2262_v57 }
  0x3b   :  { %581 = vmatpush.bf16.msrb.mxu3 %v2326_v39  ;;  %v3151_v39 = vld [vmem:[#allocation3 + $0x274] sm:$0xf0] }
  0x3c   :  { %606 = vmatpush.bf16.msra.mxu1 %v2338_v15  ;;  %593 = vmatpush.bf16.msra.mxu0 %v2274_v47  ;;  %v3107_v15 = vld [vmem:[#allocation3 + $0x114] sm:$0xf0]  ;;  %v2423_v43 = vor.u32 %v3151_v39, %v2422_v37  ;;  %v2400_v37 = vld [vmem:[#allocation3 + $0x248] sm:$0xf0]  ;;  %v2446_v39 = vld [vmem:[#allocation3 + $0x2a0] sm:$0xf] }
  0x3e   :  { %569 = vmatpush.bf16.msrb.mxu2 %v2254_v5  ;;  %v3162_v5 = vld [vmem:[#allocation3 + $0x2d4] sm:$0xf] }
  0x3f   :  { %582 = vmatpush.bf16.msrb.mxu3 %v2318_v51 }
  0x40   :  { %607 = vmatpush.bf16.msra.mxu1 %v2330_v41  ;;  %594 = vmatpush.bf16.msra.mxu0 %v2266_v59  ;;  %v2424_v41 = vld [vmem:[#allocation3 + $0x278] sm:$0xf0] }
  0x41   :  { %v2427_v44 = vor.u32 %v3150_v40, %v2424_v41  ;;  %v3157_v40 = vld [vmem:[#allocation3 + $0x2a4] sm:$0xf0]  ;;  %v3156_v41 = vld [vmem:[#allocation3 + $0x2a4] sm:$0xf] }
  0x43   :  { %583 = vmatpush.bf16.msrb.mxu3 %v2310_v63 }
  0x44   :  { %608 = vmatpush.bf16.msra.mxu1 %v2322_v53  ;;  %595 = vmatpush.bf16.msra.mxu0 %v2258_v7  ;;  %v2472_v7 = vld [vmem:[#allocation3 + $0x2d8] sm:$0xf0] }
  0x47   :  { %584 = vmatpush.bf16.msrb.mxu3 %v2302_v11  ;;  %v2415_v11 = vor.u32 %v3149_v9, %v2414_v8  ;;  %v2376_v9 = vld [vmem:[#allocation3 + $0x218] sm:$0xf0] }
  0x48   :  { %609 = vmatpush.bf16.msra.mxu1 %v2314_v1 }
  0x8c   :  { %v80_v16 = vpop.f32.mrf.mxu0 }
  0x8d   :  { %v81_v18 = vadd.f32 %v80_v16, %v51_v13  ;;  %v2306_v13 = vor.u32 %v3120_v10, %v2303_v12  ;;  %v3106_v16 = vld [vmem:[#allocation3 + $0x114] sm:$0xf]  ;;  %v2475_v10 = vor.u32 %v3162_v5, %v2472_v7  ;;  %v3148_v12 = vld [vmem:[#allocation3 + $0x264] sm:$0xf]  ;;  %v2374_v5 = vld [vmem:[#allocation3 + $0x210] sm:$0xf] }
  0x8e   :  { %v93_v17 = vpop.f32.mrf.mxu1  ;;  %v3138_v7 = vld [vmem:[#allocation3 + $0x214] sm:$0xf] }
  0x8f   :  { %v94_v19 = vadd.f32 %v93_v17, %v52_v14  ;;  %v97_v20 = vpack.c.bf16 %v81_v18, %v81_v18  ;;  %v2245_v14 = vld [vmem:[#allocation3 + $0x110] sm:$0xf]  ;;  %v2247_v18 = vld [vmem:[#allocation3 + $0x118] sm:$0xf0]  ;;  %610 = vmatpush.bf16.msra.mxu1 %v2306_v13  ;;  %v2416_v13 = vld [vmem:[#allocation3 + $0x268] sm:$0xf0] }
  0x90   :  { %v2246_v17 = vor.u32 %v3107_v15, %v2245_v14  ;;  %v2462_v14 = vld [vmem:[#allocation3 + $0x2c0] sm:$0xf]  ;;  %v2419_v15 = vor.u32 %v3148_v12, %v2416_v13  ;;  %v3137_v12 = vld [vmem:[#allocation3 + $0x204] sm:$0xf0]  ;;  %v3136_v13 = vld [vmem:[#allocation3 + $0x204] sm:$0xf] }
  0x91   :  { %v98_v21 = vpack.c.bf16 %v94_v19, %v94_v19  ;;  %v99_v22 = vunpack.c.l.bf16 %v97_v20  ;;  %v2250_v19 = vor.u32 %v3106_v16, %v2247_v18  ;;  %v2237_v20 = vld [vmem:[#allocation3 + $0x100] sm:$0xf]  ;;  %v3161_v16 = vld [vmem:[#allocation3 + $0x2c4] sm:$0xf0]  ;;  %v2464_v18 = vld [vmem:[#allocation3 + $0x2c8] sm:$0xf0] }
  0x92   :  { %570 = vmatpush.bf16.msrb.mxu2 %v2246_v17  ;;  %v3160_v17 = vld [vmem:[#allocation3 + $0x2c4] sm:$0xf] }
  0x93   :  { %v100_v23 = vunpack.c.l.bf16 %v98_v21  ;;  %3317 = vtanh.f32 %v99_v22  ;;  %596 = vmatpush.bf16.msra.mxu0 %v2250_v19  ;;  %v3105_v21 = vld [vmem:[#allocation3 + $0x104] sm:$0xf0]  ;;  %v3104_v22 = vld [vmem:[#allocation3 + $0x104] sm:$0xf]  ;;  %v2463_v19 = vor.u32 %v3161_v16, %v2462_v14 }
  0x94   :  { %v82_v24 = vpop.f32.mrf.mxu0 }
  0x95   :  { %3319 = vtanh.f32 %v100_v23  ;;  %v2238_v23 = vor.u32 %v3105_v21, %v2237_v20  ;;  %v2239_v24 = vld [vmem:[#allocation3 + $0x108] sm:$0xf0]  ;;  %v2467_v20 = vor.u32 %v3160_v17, %v2464_v18  ;;  %v2406_v21 = vld [vmem:[#allocation3 + $0x250] sm:$0xf] }
  0x96   :  { %v95_v25 = vpop.f32.mrf.mxu1  ;;  %v2234_v17 = vld [vmem:[%s3549_s5 + $0x2] ss:$8 sm:$0x3]  ;;  %v2615_v18 = vld [vmem:[#allocation3 + $0x3f0] sm:$0xf] }
  0x97   :  { %v2242_v25 = vor.u32 %v3104_v22, %v2239_v24  ;;  %571 = vmatpush.bf16.msrb.mxu2 %v2238_v23  ;;  %v3147_v22 = vld [vmem:[#allocation3 + $0x254] sm:$0xf0]  ;;  %v3146_v23 = vld [vmem:[#allocation3 + $0x254] sm:$0xf] }
  0x98   :  { %v2407_v24 = vor.u32 %v3147_v22, %v2406_v21  ;;  %v2617_v22 = vld [vmem:[#allocation3 + $0x3f8] sm:$0xf0] }
  0x99   :  { %v3318_v26 = vpop.eup %3317  ;;  %597 = vmatpush.bf16.msra.mxu0 %v2242_v25  ;;  %v2408_v25 = vld [vmem:[#allocation3 + $0x258] sm:$0xf0] }
  0x9a   :  { %v103_v28 = vpack.c.bf16 %v3318_v26, %v3318_v26  ;;  %v2105_v26 = vld [vmem:[%s3549_s5 + $0x1] ss:$8 sm:$0x3] }
  0x9b   :  { %v3320_v27 = vpop.eup %3319  ;;  %v141_v45 = vperm.slane %v2105_v26, 1  ;;  %v140_v50 = vperm.slane %v2105_v26, 0  ;;  %v2454_v26 = vld [vmem:[#allocation3 + $0x2b0] sm:$0xf] }
  0x9c   :  { %v104_v29 = vpack.c.bf16 %v3320_v27, %v3320_v27  ;;  %312 = vmatmul.bf16.vlgmr.msra.gmra.mxu2 %v103_v28  ;;  %338 = vmatmul.bf16.vlgmr.msrb.gmra.mxu0 %v103_v28  ;;  %v2486_v27 = vld [vmem:[#allocation3 + $0x2f0] sm:$0xf]  ;;  %v3167_v28 = vld [vmem:[#allocation3 + $0x2f4] sm:$0xf0] }
  0x9d   :  { %v2487_v30 = vor.u32 %v3167_v28, %v2486_v27  ;;  %824 = vmatpush.bf16.msra.mxu2 %v2423_v43  ;;  %850 = vmatpush.bf16.msrb.mxu0 %v2427_v44  ;;  %v3159_v27 = vld [vmem:[#allocation3 + $0x2b4] sm:$0xf0]  ;;  %v2411_v28 = vor.u32 %v3146_v23, %v2408_v25  ;;  %v2448_v43 = vld [vmem:[#allocation3 + $0x2a8] sm:$0xf0]  ;;  %v2607_v23 = vld [vmem:[#allocation3 + $0x3e0] sm:$0xf] }
  0x9e   :  { %325 = vmatmul.bf16.vlgmr.msra.gmra.mxu3 %v104_v29  ;;  %351 = vmatmul.bf16.vlgmr.msrb.gmra.mxu1 %v104_v29  ;;  %v3166_v29 = vld [vmem:[#allocation3 + $0x2f4] sm:$0xf]  ;;  %v2451_v44 = vor.u32 %v3156_v41, %v2448_v43  ;;  %v400_v43 = vperm.slane %v2234_v17, 0 }
  0x9f   :  { %v2491_v34 = vor.u32 %v3166_v29, %v2488_v31  ;;  %837 = vmatpush.bf16.msra.mxu3 %v2487_v30  ;;  %v2455_v29 = vor.u32 %v3159_v27, %v2454_v26  ;;  %v3158_v30 = vld [vmem:[#allocation3 + $0x2b4] sm:$0xf]  ;;  %v2456_v31 = vld [vmem:[#allocation3 + $0x2b8] sm:$0xf0]  ;;  %v3196_v27 = vld [vmem:[#allocation3 + $0x3e4] sm:$0xf] }
  0xa0   :  { %v2459_v32 = vor.u32 %v3158_v30, %v2456_v31  ;;  %v3183_v31 = vld [vmem:[#allocation3 + $0x374] sm:$0xf0] }
  0xa1   :  { %863 = vmatpush.bf16.msrb.mxu1 %v2491_v34  ;;  %825 = vmatpush.bf16.msra.mxu2 %v2415_v11  ;;  %v3145_v34 = vld [vmem:[#allocation3 + $0x244] sm:$0xf0]  ;;  %v2366_v11 = vld [vmem:[#allocation3 + $0x200] sm:$0xf] }
  0xa2   :  { %851 = vmatpush.bf16.msrb.mxu0 %v2419_v15  ;;  %v2399_v36 = vor.u32 %v3145_v34, %v2398_v33  ;;  %v2367_v14 = vor.u32 %v3137_v12, %v2366_v11  ;;  %v2368_v15 = vld [vmem:[#allocation3 + $0x208] sm:$0xf0]  ;;  %v2553_v33 = vld [vmem:[#allocation3 + $0x378] sm:$0xf0]  ;;  %v2535_v12 = vld [vmem:[#allocation3 + $0x350] sm:$0xf] }
  0xa3   :  { %838 = vmatpush.bf16.msra.mxu3 %v2479_v38  ;;  %v2403_v38 = vor.u32 %v3144_v35, %v2400_v37  ;;  %v2371_v16 = vor.u32 %v3136_v13, %v2368_v15  ;;  %v401_v37 = vperm.slane %v2234_v17, 1  ;;  %v3179_v13 = vld [vmem:[#allocation3 + $0x354] sm:$0xf0]  ;;  %v2583_v17 = vld [vmem:[#allocation3 + $0x3b0] sm:$0xf] }
  0xa4   :  { %v2536_v15 = vor.u32 %v3179_v13, %v2535_v12  ;;  %v2746_v13 = vld [vmem:[#allocation3 + $0x4f8] sm:$0xf0] }
  0xa5   :  { %864 = vmatpush.bf16.msrb.mxu1 %v2483_v42  ;;  %826 = vmatpush.bf16.msra.mxu2 %v2407_v24  ;;  %v2447_v42 = vor.u32 %v3157_v40, %v2446_v39  ;;  %v3197_v24 = vld [vmem:[#allocation3 + $0x3e4] sm:$0xf0] }
  0xa6   :  { %852 = vmatpush.bf16.msrb.mxu0 %v2411_v28  ;;  %v2609_v28 = vld [vmem:[#allocation3 + $0x3e8] sm:$0xf0]  ;;  %v2608_v30 = vor.u32 %v3197_v24, %v2607_v23  ;;  %v2527_v24 = vld [vmem:[#allocation3 + $0x340] sm:$0xf] }
  0xa7   :  { %839 = vmatpush.bf16.msra.mxu3 %v2471_v6  ;;  %v3139_v6 = vld [vmem:[#allocation3 + $0x214] sm:$0xf0]  ;;  %v2612_v34 = vor.u32 %v3196_v27, %v2609_v28  ;;  %v2529_v28 = vld [vmem:[#allocation3 + $0x348] sm:$0xf0] }
  0xa8   :  { %v2375_v8 = vor.u32 %v3139_v6, %v2374_v5  ;;  %v2591_v5 = vld [vmem:[#allocation3 + $0x3c0] sm:$0xf] }
  0xa9   :  { %865 = vmatpush.bf16.msrb.mxu1 %v2475_v10  ;;  %827 = vmatpush.bf16.msra.mxu2 %v2399_v36  ;;  %v2379_v10 = vor.u32 %v3138_v7, %v2376_v9  ;;  %v3193_v7 = vld [vmem:[#allocation3 + $0x3c4] sm:$0xf0]  ;;  %v2593_v9 = vld [vmem:[#allocation3 + $0x3c8] sm:$0xf0] }
  0xaa   :  { %853 = vmatpush.bf16.msrb.mxu0 %v2403_v38 }
  0xab   :  { %840 = vmatpush.bf16.msra.mxu3 %v2463_v19  ;;  %v3199_v19 = vld [vmem:[#allocation3 + $0x3f4] sm:$0xf0] }
  0xac   :  { %v2616_v21 = vor.u32 %v3199_v19, %v2615_v18  ;;  %v3191_v18 = vld [vmem:[#allocation3 + $0x3b4] sm:$0xf0] }
  0xad   :  { %866 = vmatpush.bf16.msrb.mxu1 %v2467_v20  ;;  %v3198_v20 = vld [vmem:[#allocation3 + $0x3f4] sm:$0xf] }
  0xae   :  { %v2620_v26 = vor.u32 %v3198_v20, %v2617_v22  ;;  %v2584_v20 = vor.u32 %v3191_v18, %v2583_v17  ;;  %v2585_v22 = vld [vmem:[#allocation3 + $0x3b8] sm:$0xf0]  ;;  %v3228_v18 = vld [vmem:[#allocation3 + $0x4e4] sm:$0xf] }
  0xaf   :  { %841 = vmatpush.bf16.msra.mxu3 %v2455_v29  ;;  %v2551_v29 = vld [vmem:[#allocation3 + $0x370] sm:$0xf] }
  0xb0   :  { %v2552_v35 = vor.u32 %v3183_v31, %v2551_v29  ;;  %v3189_v31 = vld [vmem:[#allocation3 + $0x3a4] sm:$0xf0] }
  0xb1   :  { %867 = vmatpush.bf16.msrb.mxu1 %v2459_v32  ;;  %v3182_v32 = vld [vmem:[#allocation3 + $0x374] sm:$0xf] }
  0xb2   :  { %v2556_v36 = vor.u32 %v3182_v32, %v2553_v33  ;;  %v3188_v32 = vld [vmem:[#allocation3 + $0x3a4] sm:$0xf] }
  0xb3   :  { %842 = vmatpush.bf16.msra.mxu3 %v2447_v42 }
  0xb5   :  { %868 = vmatpush.bf16.msrb.mxu1 %v2451_v44 }
 0x119   :  { %v339_v46 = vpop.f32.mrf.mxu0 }
 0x11a   :  { %v340_v47 = vadd.f32 %v339_v46, %v141_v45  ;;  %v2390_v45 = vld [vmem:[#allocation3 + $0x230] sm:$0xf]  ;;  %v3143_v46 = vld [vmem:[#allocation3 + $0x234] sm:$0xf0] }
 0x11b   :  { %v352_v48 = vpop.f32.mrf.mxu1 }
 0x11c   :  { %v353_v49 = vadd.f32 %v352_v48, %v340_v47  ;;  %v3142_v47 = vld [vmem:[#allocation3 + $0x234] sm:$0xf]  ;;  %v2391_v48 = vor.u32 %v3143_v46, %v2390_v45 }
 0x11e   :  { %v357_v51 = vpack.c.bf16 %v353_v49, %v353_v49  ;;  %v2392_v49 = vld [vmem:[#allocation3 + $0x238] sm:$0xf0]  ;;  %828 = vmatpush.bf16.msra.mxu2 %v2391_v48 }
 0x11f   :  { %v313_v52 = vpop.f32.mrf.mxu2 }
 0x120   :  { %v359_v53 = vunpack.c.l.bf16 %v357_v51  ;;  %v314_v54 = vadd.f32 %v313_v52, %v140_v50  ;;  %v2395_v50 = vor.u32 %v3142_v47, %v2392_v49  ;;  %v2438_v51 = vld [vmem:[#allocation3 + $0x290] sm:$0xf]  ;;  %v3155_v52 = vld [vmem:[#allocation3 + $0x294] sm:$0xf0] }
 0x121   :  { %v326_v55 = vpop.f32.mrf.mxu3  ;;  %v341_v56 = vpop.f32.mrf.mxu0 }
 0x122   :  { %3321 = vtanh.f32 %v359_v53  ;;  %v327_v57 = vadd.f32 %v326_v55, %v314_v54  ;;  %v3154_v53 = vld [vmem:[#allocation3 + $0x294] sm:$0xf]  ;;  %v2439_v54 = vor.u32 %v3155_v52, %v2438_v51  ;;  %v2440_v55 = vld [vmem:[#allocation3 + $0x298] sm:$0xf0]  ;;  %854 = vmatpush.bf16.msrb.mxu0 %v2395_v50 }
 0x123   :  { %v354_v58 = vpop.f32.mrf.mxu1  ;;  %v2443_v56 = vor.u32 %v3154_v53, %v2440_v55 }
 0x124   :  { %v356_v59 = vpack.c.bf16 %v327_v57, %v327_v57  ;;  %v2382_v57 = vld [vmem:[#allocation3 + $0x220] sm:$0xf]  ;;  %v3141_v58 = vld [vmem:[#allocation3 + $0x224] sm:$0xf0]  ;;  %843 = vmatpush.bf16.msra.mxu3 %v2439_v54 }
 0x125   :  { %869 = vmatpush.bf16.msrb.mxu1 %v2443_v56 }
 0x126   :  { %v358_v60 = vunpack.c.l.bf16 %v356_v59  ;;  %v3140_v59 = vld [vmem:[#allocation3 + $0x224] sm:$0xf] }
 0x127   :  { %v315_v61 = vpop.f32.mrf.mxu2 }
 0x128   :  { %v3322_v62 = vpop.eup %3321  ;;  %3323 = vtanh.f32 %v358_v60  ;;  %v2383_v60 = vor.u32 %v3141_v58, %v2382_v57  ;;  %v2384_v61 = vld [vmem:[#allocation3 + $0x228] sm:$0xf0]  ;;  %v2599_v58 = vld [vmem:[#allocation3 + $0x3d0] sm:$0xf] }
 0x129   :  { %v328_v63 = vpop.f32.mrf.mxu3  ;;  %v363_v0 = vpack.c.bf16 %v3322_v62, %v3322_v62  ;;  %v2387_v62 = vor.u32 %v3140_v59, %v2384_v61  ;;  %v3195_v59 = vld [vmem:[#allocation3 + $0x3d4] sm:$0xf0] }
 0x12a   :  { %v2430_v63 = vld [vmem:[#allocation3 + $0x280] sm:$0xf]  ;;  %829 = vmatpush.bf16.msra.mxu2 %v2383_v60  ;;  %v3194_v60 = vld [vmem:[#allocation3 + $0x3d4] sm:$0xf]  ;;  %v2600_v61 = vor.u32 %v3195_v59, %v2599_v58  ;;  %v2561_v58 = vld [vmem:[#allocation3 + $0x388] sm:$0xf0] }
 0x12b   :  { %585 = vmatmul.bf16.vlgmr.msrb.gmra.mxu3 %v363_v0  ;;  %611 = vmatmul.bf16.vlgmr.msra.gmra.mxu1 %v363_v0  ;;  %v3153_v0 = vld [vmem:[#allocation3 + $0x284] sm:$0xf0] }
 0x12c   :  { %855 = vmatpush.bf16.msrb.mxu0 %v2387_v62  ;;  %v2601_v62 = vld [vmem:[#allocation3 + $0x3d8] sm:$0xf0] }
 0x12e   :  { %v3324_v1 = vpop.eup %3323  ;;  %830 = vmatpush.bf16.msra.mxu2 %v2375_v8  ;;  %v3192_v8 = vld [vmem:[#allocation3 + $0x3c4] sm:$0xf] }
 0x12f   :  { %v362_v2 = vpack.c.bf16 %v3324_v1, %v3324_v1  ;;  %v3152_v1 = vld [vmem:[#allocation3 + $0x284] sm:$0xf]  ;;  %v2596_v11 = vor.u32 %v3192_v8, %v2593_v9  ;;  %v2363_v8 = vld [vmem:[%s3549_s5 + $0x3] ss:$8 sm:$0x3] }
 0x130   :  { %v2435_v4 = vor.u32 %v3152_v1, %v2432_v3  ;;  %856 = vmatpush.bf16.msrb.mxu0 %v2379_v10  ;;  %v2604_v1 = vor.u32 %v3194_v60, %v2601_v62  ;;  %v3180_v3 = vld [vmem:[#allocation3 + $0x364] sm:$0xf]  ;;  %v2592_v10 = vor.u32 %v3193_v7, %v2591_v5  ;;  %v2503_v60 = vld [vmem:[#allocation3 + $0x310] sm:$0xf]  ;;  %v3170_v62 = vld [vmem:[#allocation3 + $0x314] sm:$0xf] }
 0x131   :  { %572 = vmatmul.bf16.vlgmr.msrb.gmra.mxu2 %v362_v2  ;;  %598 = vmatmul.bf16.vlgmr.msra.gmra.mxu0 %v362_v2  ;;  %v2431_v2 = vor.u32 %v3153_v0, %v2430_v63  ;;  %v2543_v63 = vld [vmem:[#allocation3 + $0x360] sm:$0xf]  ;;  %v3181_v0 = vld [vmem:[#allocation3 + $0x364] sm:$0xf0]  ;;  %v2744_v9 = vld [vmem:[#allocation3 + $0x4f0] sm:$0xf] }
 0x132   :  { %870 = vmatpush.bf16.msrb.mxu1 %v2435_v4  ;;  %831 = vmatpush.bf16.msra.mxu2 %v2367_v14  ;;  %v2545_v4 = vld [vmem:[#allocation3 + $0x368] sm:$0xf0]  ;;  %v3178_v14 = vld [vmem:[#allocation3 + $0x354] sm:$0xf] }
 0x133   :  { %844 = vmatpush.bf16.msra.mxu3 %v2431_v2  ;;  %v2544_v2 = vor.u32 %v3181_v0, %v2543_v63  ;;  %v2548_v6 = vor.u32 %v3180_v3, %v2545_v4  ;;  %v2505_v0 = vld [vmem:[#allocation3 + $0x318] sm:$0xf0]  ;;  %v3169_v3 = vld [vmem:[#allocation3 + $0x304] sm:$0xf0]  ;;  %v3168_v4 = vld [vmem:[#allocation3 + $0x304] sm:$0xf] }
 0x134   :  { %857 = vmatpush.bf16.msrb.mxu0 %v2371_v16  ;;  %v2537_v16 = vld [vmem:[#allocation3 + $0x358] sm:$0xf0] }
 0x135   :  { %v2540_v19 = vor.u32 %v3178_v14, %v2537_v16  ;;  %v2736_v14 = vld [vmem:[#allocation3 + $0x4e0] sm:$0xf] }
 0x136   :  { %1123 = vmatpush.bf16.msra.mxu1 %v2620_v26  ;;  %1084 = vmatpush.bf16.msrb.mxu2 %v2552_v35  ;;  %v3176_v26 = vld [vmem:[#allocation3 + $0x344] sm:$0xf] }
 0x137   :  { %1097 = vmatpush.bf16.msrb.mxu3 %v2616_v21  ;;  %v3190_v21 = vld [vmem:[#allocation3 + $0x3b4] sm:$0xf]  ;;  %v2532_v29 = vor.u32 %v3176_v26, %v2529_v28  ;;  %v661_v28 = vperm.slane %v2363_v8, 1 }
 0x138   :  { %1110 = vmatpush.bf16.msra.mxu0 %v2556_v36  ;;  %v2588_v23 = vor.u32 %v3190_v21, %v2585_v22  ;;  %v2519_v36 = vld [vmem:[#allocation3 + $0x330] sm:$0xf]  ;;  %v3215_v22 = vld [vmem:[#allocation3 + $0x474] sm:$0xf0] }
 0x13a   :  { %1124 = vmatpush.bf16.msra.mxu1 %v2612_v34  ;;  %1085 = vmatpush.bf16.msrb.mxu2 %v2544_v2  ;;  %v2577_v34 = vld [vmem:[#allocation3 + $0x3a8] sm:$0xf0]  ;;  %v2495_v2 = vld [vmem:[#allocation3 + $0x300] sm:$0xf] }
 0x13b   :  { %1098 = vmatpush.bf16.msrb.mxu3 %v2608_v30  ;;  %v2575_v30 = vld [vmem:[#allocation3 + $0x3a0] sm:$0xf]  ;;  %v2580_v35 = vor.u32 %v3188_v32, %v2577_v34  ;;  %v2496_v5 = vor.u32 %v3169_v3, %v2495_v2  ;;  %v660_v34 = vperm.slane %v2363_v8, 0  ;;  %v2664_v3 = vld [vmem:[#allocation3 + $0x450] sm:$0xf] }
 0x13c   :  { %1111 = vmatpush.bf16.msra.mxu0 %v2548_v6  ;;  %v2576_v33 = vor.u32 %v3189_v31, %v2575_v30  ;;  %v2497_v6 = vld [vmem:[#allocation3 + $0x308] sm:$0xf0]  ;;  %v2712_v8 = vld [vmem:[#allocation3 + $0x4b0] sm:$0xf] }
 0x13d   :  { %v2500_v7 = vor.u32 %v3168_v4, %v2497_v6  ;;  %v3211_v4 = vld [vmem:[#allocation3 + $0x454] sm:$0xf0] }
 0x13e   :  { %1125 = vmatpush.bf16.msra.mxu1 %v2604_v1  ;;  %1086 = vmatpush.bf16.msrb.mxu2 %v2536_v15  ;;  %v2508_v1 = vor.u32 %v3170_v62, %v2505_v0  ;;  %v3229_v15 = vld [vmem:[#allocation3 + $0x4e4] sm:$0xf0]  ;;  %v2722_v0 = vld [vmem:[#allocation3 + $0x4c8] sm:$0xf0]  ;;  %v2665_v6 = vor.u32 %v3211_v4, %v2664_v3  ;;  %v2875_v4 = vld [vmem:[#allocation3 + $0x5f8] sm:$0xf0] }
 0x13f   :  { %1099 = vmatpush.bf16.msrb.mxu3 %v2600_v61  ;;  %v3171_v61 = vld [vmem:[#allocation3 + $0x314] sm:$0xf0]  ;;  %v2737_v21 = vor.u32 %v3229_v15, %v2736_v14  ;;  %v3225_v62 = vld [vmem:[#allocation3 + $0x4c4] sm:$0xf0]  ;;  %v2656_v15 = vld [vmem:[#allocation3 + $0x440] sm:$0xf] }
 0x140   :  { %1112 = vmatpush.bf16.msra.mxu0 %v2540_v19  ;;  %v2504_v63 = vor.u32 %v3171_v61, %v2503_v60  ;;  %v2738_v19 = vld [vmem:[#allocation3 + $0x4e8] sm:$0xf0]  ;;  %v2720_v60 = vld [vmem:[#allocation3 + $0x4c0] sm:$0xf] }
 0x142   :  { %1126 = vmatpush.bf16.msra.mxu1 %v2596_v11  ;;  %v3230_v11 = vld [vmem:[#allocation3 + $0x4f4] sm:$0xf] }
 0x143   :  { %1100 = vmatpush.bf16.msrb.mxu3 %v2592_v10  ;;  %v3231_v10 = vld [vmem:[#allocation3 + $0x4f4] sm:$0xf0]  ;;  %v2749_v17 = vor.u32 %v3230_v11, %v2746_v13  ;;  %v2714_v13 = vld [vmem:[#allocation3 + $0x4b8] sm:$0xf0] }
 0x144   :  { %1113 = vmatpush.bf16.msra.mxu0 %v2532_v29  ;;  %v2745_v12 = vor.u32 %v3231_v10, %v2744_v9  ;;  %v3223_v9 = vld [vmem:[#allocation3 + $0x4b4] sm:$0xf0] }
 0x145   :  { %v2713_v11 = vor.u32 %v3223_v9, %v2712_v8  ;;  %v3260_v9 = vld [vmem:[#allocation3 + $0x5e4] sm:$0xf] }
 0x146   :  { %1127 = vmatpush.bf16.msra.mxu1 %v2588_v23  ;;  %v3214_v23 = vld [vmem:[#allocation3 + $0x474] sm:$0xf] }
 0x147   :  { %1101 = vmatpush.bf16.msrb.mxu3 %v2584_v20  ;;  %v2680_v20 = vld [vmem:[#allocation3 + $0x470] sm:$0xf] }
 0x148   :  { %v2681_v26 = vor.u32 %v3215_v22, %v2680_v20  ;;  %v3221_v22 = vld [vmem:[#allocation3 + $0x4a4] sm:$0xf0] }
 0x14a   :  { %1128 = vmatpush.bf16.msra.mxu1 %v2580_v35 }
 0x14b   :  { %1102 = vmatpush.bf16.msrb.mxu3 %v2576_v33 }
 0x1a8   :  { %v612_v25 = vpop.f32.mrf.mxu1 }
 0x1ae   :  { %v586_v38 = vpop.f32.mrf.mxu3  ;;  %v599_v39 = vpop.f32.mrf.mxu0 }
 0x1af   :  { %v600_v40 = vadd.f32 %v599_v39, %v401_v37  ;;  %v3175_v37 = vld [vmem:[#allocation3 + $0x334] sm:$0xf0] }
 0x1b0   :  { %v614_v41 = vpop.f32.mrf.mxu1  ;;  %v2520_v39 = vor.u32 %v3175_v37, %v2519_v36 }
 0x1b1   :  { %v613_v42 = vadd.f32 %v612_v25, %v600_v40  ;;  %v3177_v25 = vld [vmem:[#allocation3 + $0x344] sm:$0xf0]  ;;  %v2521_v40 = vld [vmem:[#allocation3 + $0x338] sm:$0xf0] }
 0x1b2   :  { %v2528_v27 = vor.u32 %v3177_v25, %v2527_v24  ;;  %v2682_v24 = vld [vmem:[#allocation3 + $0x478] sm:$0xf0]  ;;  %v2741_v25 = vor.u32 %v3228_v18, %v2738_v19  ;;  %v2658_v19 = vld [vmem:[#allocation3 + $0x448] sm:$0xf0] }
 0x1b3   :  { %v617_v44 = vpack.c.bf16 %v613_v42, %v613_v42  ;;  %v2567_v42 = vld [vmem:[#allocation3 + $0x390] sm:$0xf] }
 0x1b4   :  { %v573_v45 = vpop.f32.mrf.mxu2  ;;  %1087 = vmatpush.bf16.msrb.mxu2 %v2528_v27  ;;  %v2685_v27 = vor.u32 %v3214_v23, %v2682_v24  ;;  %v3220_v23 = vld [vmem:[#allocation3 + $0x4a4] sm:$0xf] }
 0x1b5   :  { %v619_v46 = vunpack.c.l.bf16 %v617_v44  ;;  %v574_v47 = vadd.f32 %v573_v45, %v400_v43  ;;  %v3187_v43 = vld [vmem:[#allocation3 + $0x394] sm:$0xf0]  ;;  %v3186_v44 = vld [vmem:[#allocation3 + $0x394] sm:$0xf] }
 0x1b6   :  { %v588_v48 = vpop.f32.mrf.mxu3  ;;  %v601_v49 = vpop.f32.mrf.mxu0  ;;  %v2568_v45 = vor.u32 %v3187_v43, %v2567_v42 }
 0x1b7   :  { %3325 = vtanh.f32 %v619_v46  ;;  %v587_v50 = vadd.f32 %v586_v38, %v574_v47  ;;  %v3174_v38 = vld [vmem:[#allocation3 + $0x334] sm:$0xf]  ;;  %v2569_v46 = vld [vmem:[#allocation3 + $0x398] sm:$0xf0]  ;;  %v2511_v48 = vld [vmem:[#allocation3 + $0x320] sm:$0xf] }
 0x1b8   :  { %v2524_v41 = vor.u32 %v3174_v38, %v2521_v40  ;;  %1088 = vmatpush.bf16.msrb.mxu2 %v2520_v39  ;;  %v2572_v47 = vor.u32 %v3186_v44, %v2569_v46  ;;  %v3173_v49 = vld [vmem:[#allocation3 + $0x324] sm:$0xf0]  ;;  %1103 = vmatpush.bf16.msrb.mxu3 %v2568_v45 }
 0x1b9   :  { %v616_v51 = vpack.c.bf16 %v587_v50, %v587_v50  ;;  %v3172_v50 = vld [vmem:[#allocation3 + $0x324] sm:$0xf] }
 0x1ba   :  { %1114 = vmatpush.bf16.msra.mxu0 %v2524_v41  ;;  %1129 = vmatpush.bf16.msra.mxu1 %v2572_v47 }
 0x1bb   :  { %v618_v52 = vunpack.c.l.bf16 %v616_v51  ;;  %v2512_v51 = vor.u32 %v3173_v49, %v2511_v48  ;;  %v2728_v49 = vld [vmem:[#allocation3 + $0x4d0] sm:$0xf] }
 0x1bc   :  { %v575_v53 = vpop.f32.mrf.mxu2 }
 0x1bd   :  { %v3326_v54 = vpop.eup %3325  ;;  %3327 = vtanh.f32 %v618_v52  ;;  %v2513_v52 = vld [vmem:[#allocation3 + $0x328] sm:$0xf0]  ;;  %1089 = vmatpush.bf16.msrb.mxu2 %v2512_v51  ;;  %v3226_v51 = vld [vmem:[#allocation3 + $0x4d4] sm:$0xf] }
 0x1be   :  { %v623_v55 = vpack.c.bf16 %v3326_v54, %v3326_v54  ;;  %v2516_v53 = vor.u32 %v3172_v50, %v2513_v52  ;;  %v2559_v54 = vld [vmem:[#allocation3 + $0x380] sm:$0xf]  ;;  %v3227_v50 = vld [vmem:[#allocation3 + $0x4d4] sm:$0xf0] }
 0x1bf   :  { %v2729_v52 = vor.u32 %v3227_v50, %v2728_v49  ;;  %v2690_v49 = vld [vmem:[#allocation3 + $0x488] sm:$0xf0] }
 0x1c0   :  { %845 = vmatmul.bf16.vlgmr.msra.gmra.mxu3 %v623_v55  ;;  %871 = vmatmul.bf16.vlgmr.msrb.gmra.mxu1 %v623_v55  ;;  %v3185_v55 = vld [vmem:[#allocation3 + $0x384] sm:$0xf0] }
 0x1c1   :  { %1115 = vmatpush.bf16.msra.mxu0 %v2516_v53  ;;  %1090 = vmatpush.bf16.msrb.mxu2 %v2504_v63  ;;  %v2730_v53 = vld [vmem:[#allocation3 + $0x4d8] sm:$0xf0]  ;;  %v3224_v63 = vld [vmem:[#allocation3 + $0x4c4] sm:$0xf] }
 0x1c2   :  { %v2725_v2 = vor.u32 %v3224_v63, %v2722_v0  ;;  %v2492_v63 = vld [vmem:[%s3549_s5 + $0x4] ss:$8 sm:$0x3]  ;;  %v2873_v0 = vld [vmem:[#allocation3 + $0x5f0] sm:$0xf] }
 0x1c3   :  { %v3328_v56 = vpop.eup %3327 }
 0x1c4   :  { %v622_v57 = vpack.c.bf16 %v3328_v56, %v3328_v56  ;;  %v3184_v56 = vld [vmem:[#allocation3 + $0x384] sm:$0xf] }
 0x1c5   :  { %v2564_v59 = vor.u32 %v3184_v56, %v2561_v58  ;;  %1116 = vmatpush.bf16.msra.mxu0 %v2508_v1  ;;  %1091 = vmatpush.bf16.msrb.mxu2 %v2496_v5  ;;  %v2733_v56 = vor.u32 %v3226_v51, %v2730_v53  ;;  %v3212_v58 = vld [vmem:[#allocation3 + $0x464] sm:$0xf]  ;;  %v2721_v1 = vor.u32 %v3225_v62, %v2720_v60  ;;  %v3210_v5 = vld [vmem:[#allocation3 + $0x454] sm:$0xf]  ;;  %v2632_v51 = vld [vmem:[#allocation3 + $0x410] sm:$0xf] }
 0x1c6   :  { %832 = vmatmul.bf16.vlgmr.msra.gmra.mxu2 %v622_v57  ;;  %858 = vmatmul.bf16.vlgmr.msrb.gmra.mxu0 %v622_v57  ;;  %v2560_v57 = vor.u32 %v3185_v55, %v2559_v54  ;;  %v2672_v54 = vld [vmem:[#allocation3 + $0x460] sm:$0xf]  ;;  %v3213_v55 = vld [vmem:[#allocation3 + $0x464] sm:$0xf0]  ;;  %v3202_v53 = vld [vmem:[#allocation3 + $0x414] sm:$0xf] }
 0x1c7   :  { %1130 = vmatpush.bf16.msra.mxu1 %v2564_v59  ;;  %v2674_v59 = vld [vmem:[#allocation3 + $0x468] sm:$0xf0] }
 0x1c8   :  { %1104 = vmatpush.bf16.msrb.mxu3 %v2560_v57  ;;  %v2673_v57 = vor.u32 %v3213_v55, %v2672_v54  ;;  %v2677_v61 = vor.u32 %v3212_v58, %v2674_v59  ;;  %v2634_v55 = vld [vmem:[#allocation3 + $0x418] sm:$0xf0]  ;;  %v3201_v58 = vld [vmem:[#allocation3 + $0x404] sm:$0xf0]  ;;  %v3200_v59 = vld [vmem:[#allocation3 + $0x404] sm:$0xf] }
 0x1c9   :  { %1117 = vmatpush.bf16.msra.mxu0 %v2500_v7  ;;  %1344 = vmatpush.bf16.msra.mxu2 %v2681_v26  ;;  %v2666_v7 = vld [vmem:[#allocation3 + $0x458] sm:$0xf0] }
 0x1ca   :  { %v2669_v10 = vor.u32 %v3210_v5, %v2666_v7  ;;  %v2865_v5 = vld [vmem:[#allocation3 + $0x5e0] sm:$0xf] }
 0x1cb   :  { %1383 = vmatpush.bf16.msrb.mxu1 %v2749_v17  ;;  %v3208_v17 = vld [vmem:[#allocation3 + $0x444] sm:$0xf] }
 0x1cc   :  { %1357 = vmatpush.bf16.msra.mxu3 %v2745_v12  ;;  %v3222_v12 = vld [vmem:[#allocation3 + $0x4b4] sm:$0xf]  ;;  %v2661_v20 = vor.u32 %v3208_v17, %v2658_v19  ;;  %v921_v19 = vperm.slane %v2492_v63, 1 }
 0x1cd   :  { %1370 = vmatpush.bf16.msrb.mxu0 %v2685_v27  ;;  %1345 = vmatpush.bf16.msra.mxu2 %v2673_v57  ;;  %v2717_v14 = vor.u32 %v3222_v12, %v2714_v13  ;;  %v2648_v27 = vld [vmem:[#allocation3 + $0x430] sm:$0xf]  ;;  %v2624_v57 = vld [vmem:[#allocation3 + $0x400] sm:$0xf]  ;;  %v3247_v13 = vld [vmem:[#allocation3 + $0x574] sm:$0xf0] }
 0x1ce   :  { %v2625_v60 = vor.u32 %v3201_v58, %v2624_v57  ;;  %v2793_v58 = vld [vmem:[#allocation3 + $0x550] sm:$0xf] }
 0x1cf   :  { %1384 = vmatpush.bf16.msrb.mxu1 %v2741_v25  ;;  %v2706_v25 = vld [vmem:[#allocation3 + $0x4a8] sm:$0xf0] }
 0x1d0   :  { %1358 = vmatpush.bf16.msra.mxu3 %v2737_v21  ;;  %v2704_v21 = vld [vmem:[#allocation3 + $0x4a0] sm:$0xf]  ;;  %v2709_v26 = vor.u32 %v3220_v23, %v2706_v25  ;;  %v920_v25 = vperm.slane %v2492_v63, 0  ;;  %v2841_v63 = vld [vmem:[#allocation3 + $0x5b0] sm:$0xf] }
 0x1d1   :  { %1371 = vmatpush.bf16.msrb.mxu0 %v2677_v61  ;;  %1346 = vmatpush.bf16.msra.mxu2 %v2665_v6  ;;  %v2705_v24 = vor.u32 %v3221_v22, %v2704_v21  ;;  %v2626_v61 = vld [vmem:[#allocation3 + $0x408] sm:$0xf0]  ;;  %v3261_v6 = vld [vmem:[#allocation3 + $0x5e4] sm:$0xf0] }
 0x1d2   :  { %v2629_v62 = vor.u32 %v3200_v59, %v2626_v61  ;;  %v2866_v12 = vor.u32 %v3261_v6, %v2865_v5  ;;  %v3243_v59 = vld [vmem:[#allocation3 + $0x554] sm:$0xf0]  ;;  %v2785_v6 = vld [vmem:[#allocation3 + $0x540] sm:$0xf] }
 0x1d3   :  { %1385 = vmatpush.bf16.msrb.mxu1 %v2733_v56  ;;  %v2637_v56 = vor.u32 %v3202_v53, %v2634_v55  ;;  %v3257_v53 = vld [vmem:[#allocation3 + $0x5c4] sm:$0xf0]  ;;  %v2851_v55 = vld [vmem:[#allocation3 + $0x5c8] sm:$0xf0]  ;;  %v2794_v61 = vor.u32 %v3243_v59, %v2793_v58  ;;  %v3004_v59 = vld [vmem:[#allocation3 + $0x6f8] sm:$0xf0] }
 0x1d4   :  { %1359 = vmatpush.bf16.msra.mxu3 %v2729_v52  ;;  %v3203_v52 = vld [vmem:[#allocation3 + $0x414] sm:$0xf0] }
 0x1d5   :  { %1372 = vmatpush.bf16.msrb.mxu0 %v2669_v10  ;;  %v2633_v54 = vor.u32 %v3203_v52, %v2632_v51  ;;  %v2867_v10 = vld [vmem:[#allocation3 + $0x5e8] sm:$0xf0]  ;;  %v2849_v51 = vld [vmem:[#allocation3 + $0x5c0] sm:$0xf] }
 0x1d7   :  { %1386 = vmatpush.bf16.msrb.mxu1 %v2725_v2  ;;  %v3262_v2 = vld [vmem:[#allocation3 + $0x5f4] sm:$0xf] }
 0x1d8   :  { %1360 = vmatpush.bf16.msra.mxu3 %v2721_v1  ;;  %v3263_v1 = vld [vmem:[#allocation3 + $0x5f4] sm:$0xf0]  ;;  %v2878_v8 = vor.u32 %v3262_v2, %v2875_v4  ;;  %v2843_v4 = vld [vmem:[#allocation3 + $0x5b8] sm:$0xf0] }
 0x1d9   :  { %1373 = vmatpush.bf16.msrb.mxu0 %v2661_v20  ;;  %v2874_v3 = vor.u32 %v3263_v1, %v2873_v0  ;;  %v3255_v0 = vld [vmem:[#allocation3 + $0x5b4] sm:$0xf0] }
 0x1da   :  { %v2842_v2 = vor.u32 %v3255_v0, %v2841_v63  ;;  %v3292_v0 = vld [vmem:[#allocation3 + $0x6e4] sm:$0xf] }
 0x1db   :  { %1387 = vmatpush.bf16.msrb.mxu1 %v2717_v14  ;;  %v3246_v14 = vld [vmem:[#allocation3 + $0x574] sm:$0xf] }
 0x1dc   :  { %1361 = vmatpush.bf16.msra.mxu3 %v2713_v11  ;;  %v2809_v11 = vld [vmem:[#allocation3 + $0x570] sm:$0xf] }
 0x1dd   :  { %v2810_v17 = vor.u32 %v3247_v13, %v2809_v11  ;;  %v3253_v13 = vld [vmem:[#allocation3 + $0x5a4] sm:$0xf0] }
 0x1df   :  { %1388 = vmatpush.bf16.msrb.mxu1 %v2709_v26 }
 0x1e0   :  { %1362 = vmatpush.bf16.msra.mxu3 %v2705_v24 }
 0x23d   :  { %v872_v16 = vpop.f32.mrf.mxu1 }
 0x243   :  { %v846_v29 = vpop.f32.mrf.mxu3  ;;  %v859_v30 = vpop.f32.mrf.mxu0 }
 0x244   :  { %v860_v31 = vadd.f32 %v859_v30, %v661_v28  ;;  %v3207_v28 = vld [vmem:[#allocation3 + $0x434] sm:$0xf0] }
 0x245   :  { %v874_v32 = vpop.f32.mrf.mxu1  ;;  %v2649_v30 = vor.u32 %v3207_v28, %v2648_v27 }
 0x246   :  { %v873_v33 = vadd.f32 %v872_v16, %v860_v31  ;;  %v3209_v16 = vld [vmem:[#allocation3 + $0x444] sm:$0xf0]  ;;  %v2650_v31 = vld [vmem:[#allocation3 + $0x438] sm:$0xf0] }
 0x247   :  { %v2657_v18 = vor.u32 %v3209_v16, %v2656_v15  ;;  %v2811_v15 = vld [vmem:[#allocation3 + $0x578] sm:$0xf0]  ;;  %v2870_v16 = vor.u32 %v3260_v9, %v2867_v10  ;;  %v2787_v10 = vld [vmem:[#allocation3 + $0x548] sm:$0xf0] }
 0x248   :  { %v877_v35 = vpack.c.bf16 %v873_v33, %v873_v33  ;;  %v2696_v33 = vld [vmem:[#allocation3 + $0x490] sm:$0xf] }
 0x249   :  { %v833_v36 = vpop.f32.mrf.mxu2  ;;  %1347 = vmatpush.bf16.msra.mxu2 %v2657_v18  ;;  %v2814_v18 = vor.u32 %v3246_v14, %v2811_v15  ;;  %v3252_v14 = vld [vmem:[#allocation3 + $0x5a4] sm:$0xf] }
 0x24a   :  { %v879_v37 = vunpack.c.l.bf16 %v877_v35  ;;  %v834_v38 = vadd.f32 %v833_v36, %v660_v34  ;;  %v3219_v34 = vld [vmem:[#allocation3 + $0x494] sm:$0xf0]  ;;  %v3218_v35 = vld [vmem:[#allocation3 + $0x494] sm:$0xf] }
 0x24b   :  { %v848_v39 = vpop.f32.mrf.mxu3  ;;  %v861_v40 = vpop.f32.mrf.mxu0  ;;  %v2697_v36 = vor.u32 %v3219_v34, %v2696_v33 }
 0x24c   :  { %3329 = vtanh.f32 %v879_v37  ;;  %v847_v41 = vadd.f32 %v846_v29, %v834_v38  ;;  %v3206_v29 = vld [vmem:[#allocation3 + $0x434] sm:$0xf]  ;;  %v2698_v37 = vld [vmem:[#allocation3 + $0x498] sm:$0xf0]  ;;  %v2640_v39 = vld [vmem:[#allocation3 + $0x420] sm:$0xf] }
 0x24d   :  { %v2653_v32 = vor.u32 %v3206_v29, %v2650_v31  ;;  %1348 = vmatpush.bf16.msra.mxu2 %v2649_v30  ;;  %v2701_v38 = vor.u32 %v3218_v35, %v2698_v37  ;;  %v3205_v40 = vld [vmem:[#allocation3 + $0x424] sm:$0xf0]  ;;  %1363 = vmatpush.bf16.msra.mxu3 %v2697_v36 }
 0x24e   :  { %v876_v42 = vpack.c.bf16 %v847_v41, %v847_v41  ;;  %v3204_v41 = vld [vmem:[#allocation3 + $0x424] sm:$0xf] }
 0x24f   :  { %1374 = vmatpush.bf16.msrb.mxu0 %v2653_v32  ;;  %1389 = vmatpush.bf16.msrb.mxu1 %v2701_v38 }
 0x250   :  { %v878_v43 = vunpack.c.l.bf16 %v876_v42  ;;  %v2641_v42 = vor.u32 %v3205_v40, %v2640_v39  ;;  %v2857_v40 = vld [vmem:[#allocation3 + $0x5d0] sm:$0xf] }
 0x251   :  { %v835_v44 = vpop.f32.mrf.mxu2 }
 0x252   :  { %v3330_v45 = vpop.eup %3329  ;;  %3331 = vtanh.f32 %v878_v43  ;;  %v2642_v43 = vld [vmem:[#allocation3 + $0x428] sm:$0xf0]  ;;  %1349 = vmatpush.bf16.msra.mxu2 %v2641_v42  ;;  %v3258_v42 = vld [vmem:[#allocation3 + $0x5d4] sm:$0xf] }
 0x253   :  { %v883_v46 = vpack.c.bf16 %v3330_v45, %v3330_v45  ;;  %v2645_v44 = vor.u32 %v3204_v41, %v2642_v43  ;;  %v2688_v45 = vld [vmem:[#allocation3 + $0x480] sm:$0xf]  ;;  %v3259_v41 = vld [vmem:[#allocation3 + $0x5d4] sm:$0xf0] }
 0x254   :  { %v2858_v43 = vor.u32 %v3259_v41, %v2857_v40  ;;  %v2819_v40 = vld [vmem:[#allocation3 + $0x588] sm:$0xf0] }
 0x255   :  { %1105 = vmatmul.bf16.vlgmr.msrb.gmra.mxu3 %v883_v46  ;;  %1131 = vmatmul.bf16.vlgmr.msra.gmra.mxu1 %v883_v46  ;;  %v3217_v46 = vld [vmem:[#allocation3 + $0x484] sm:$0xf0] }
 0x256   :  { %1375 = vmatpush.bf16.msrb.mxu0 %v2645_v44  ;;  %1350 = vmatpush.bf16.msra.mxu2 %v2633_v54  ;;  %v2859_v44 = vld [vmem:[#allocation3 + $0x5d8] sm:$0xf0]  ;;  %v3256_v54 = vld [vmem:[#allocation3 + $0x5c4] sm:$0xf] }
 0x257   :  { %v2854_v57 = vor.u32 %v3256_v54, %v2851_v55  ;;  %v2621_v54 = vld [vmem:[%s3549_s5 + $0x5] ss:$8 sm:$0x3]  ;;  %v3002_v55 = vld [vmem:[#allocation3 + $0x6f0] sm:$0xf] }
 0x258   :  { %v3332_v47 = vpop.eup %3331 }
 0x259   :  { %v882_v48 = vpack.c.bf16 %v3332_v47, %v3332_v47  ;;  %v3216_v47 = vld [vmem:[#allocation3 + $0x484] sm:$0xf] }
 0x25a   :  { %v2693_v50 = vor.u32 %v3216_v47, %v2690_v49  ;;  %1376 = vmatpush.bf16.msrb.mxu0 %v2637_v56  ;;  %1351 = vmatpush.bf16.msra.mxu2 %v2625_v60  ;;  %v2862_v47 = vor.u32 %v3258_v42, %v2859_v44  ;;  %v3244_v49 = vld [vmem:[#allocation3 + $0x564] sm:$0xf]  ;;  %v2850_v56 = vor.u32 %v3257_v53, %v2849_v51  ;;  %v3242_v60 = vld [vmem:[#allocation3 + $0x554] sm:$0xf]  ;;  %v2761_v42 = vld [vmem:[#allocation3 + $0x510] sm:$0xf] }
 0x25b   :  { %1092 = vmatmul.bf16.vlgmr.msrb.gmra.mxu2 %v882_v48  ;;  %1118 = vmatmul.bf16.vlgmr.msra.gmra.mxu0 %v882_v48  ;;  %v2689_v48 = vor.u32 %v3217_v46, %v2688_v45  ;;  %v2801_v45 = vld [vmem:[#allocation3 + $0x560] sm:$0xf]  ;;  %v3245_v46 = vld [vmem:[#allocation3 + $0x564] sm:$0xf0]  ;;  %v3234_v44 = vld [vmem:[#allocation3 + $0x514] sm:$0xf] }
 0x25c   :  { %1390 = vmatpush.bf16.msrb.mxu1 %v2693_v50  ;;  %v2803_v50 = vld [vmem:[#allocation3 + $0x568] sm:$0xf0] }
 0x25d   :  { %1364 = vmatpush.bf16.msra.mxu3 %v2689_v48  ;;  %v2802_v48 = vor.u32 %v3245_v46, %v2801_v45  ;;  %v2806_v52 = vor.u32 %v3244_v49, %v2803_v50  ;;  %v2763_v46 = vld [vmem:[#allocation3 + $0x518] sm:$0xf0]  ;;  %v3233_v49 = vld [vmem:[#allocation3 + $0x504] sm:$0xf0]  ;;  %v3232_v50 = vld [vmem:[#allocation3 + $0x504] sm:$0xf] }
 0x25e   :  { %1377 = vmatpush.bf16.msrb.mxu0 %v2629_v62  ;;  %1604 = vmatpush.bf16.msrb.mxu2 %v2810_v17  ;;  %v2795_v62 = vld [vmem:[#allocation3 + $0x558] sm:$0xf0] }
 0x25f   :  { %v2798_v1 = vor.u32 %v3242_v60, %v2795_v62  ;;  %v2994_v60 = vld [vmem:[#allocation3 + $0x6e0] sm:$0xf] }
 0x260   :  { %1643 = vmatpush.bf16.msra.mxu1 %v2878_v8  ;;  %v3240_v8 = vld [vmem:[#allocation3 + $0x544] sm:$0xf] }
 0x261   :  { %1617 = vmatpush.bf16.msrb.mxu3 %v2874_v3  ;;  %v3254_v3 = vld [vmem:[#allocation3 + $0x5b4] sm:$0xf]  ;;  %v2790_v11 = vor.u32 %v3240_v8, %v2787_v10  ;;  %v1181_v10 = vperm.slane %v2621_v54, 1 }
 0x262   :  { %1630 = vmatpush.bf16.msra.mxu0 %v2814_v18  ;;  %1605 = vmatpush.bf16.msrb.mxu2 %v2802_v48  ;;  %v2846_v5 = vor.u32 %v3254_v3, %v2843_v4  ;;  %v2777_v18 = vld [vmem:[#allocation3 + $0x530] sm:$0xf]  ;;  %v2753_v48 = vld [vmem:[#allocation3 + $0x500] sm:$0xf]  ;;  %v3279_v4 = vld [vmem:[#allocation3 + $0x674] sm:$0xf0] }
 0x263   :  { %v2754_v51 = vor.u32 %v3233_v49, %v2753_v48  ;;  %v2922_v49 = vld [vmem:[#allocation3 + $0x650] sm:$0xf] }
 0x264   :  { %1644 = vmatpush.bf16.msra.mxu1 %v2870_v16  ;;  %v2835_v16 = vld [vmem:[#allocation3 + $0x5a8] sm:$0xf0] }
 0x265   :  { %1618 = vmatpush.bf16.msrb.mxu3 %v2866_v12  ;;  %v2833_v12 = vld [vmem:[#allocation3 + $0x5a0] sm:$0xf]  ;;  %v2838_v17 = vor.u32 %v3252_v14, %v2835_v16  ;;  %v1180_v16 = vperm.slane %v2621_v54, 0  ;;  %v2970_v54 = vld [vmem:[#allocation3 + $0x6b0] sm:$0xf] }
 0x266   :  { %1631 = vmatpush.bf16.msra.mxu0 %v2806_v52  ;;  %1606 = vmatpush.bf16.msrb.mxu2 %v2794_v61  ;;  %v2834_v15 = vor.u32 %v3253_v13, %v2833_v12  ;;  %v2755_v52 = vld [vmem:[#allocation3 + $0x508] sm:$0xf0]  ;;  %v3293_v61 = vld [vmem:[#allocation3 + $0x6e4] sm:$0xf0] }
 0x267   :  { %v2758_v53 = vor.u32 %v3232_v50, %v2755_v52  ;;  %v2995_v3 = vor.u32 %v3293_v61, %v2994_v60  ;;  %v3275_v50 = vld [vmem:[#allocation3 + $0x654] sm:$0xf0]  ;;  %v2914_v61 = vld [vmem:[#allocation3 + $0x640] sm:$0xf] }
 0x268   :  { %1645 = vmatpush.bf16.msra.mxu1 %v2862_v47  ;;  %v2766_v47 = vor.u32 %v3234_v44, %v2763_v46  ;;  %v3289_v44 = vld [vmem:[#allocation3 + $0x6c4] sm:$0xf0]  ;;  %v2980_v46 = vld [vmem:[#allocation3 + $0x6c8] sm:$0xf0]  ;;  %v2923_v52 = vor.u32 %v3275_v50, %v2922_v49  ;;  %v3310_v49 = vld [vmem:[%s3548_s4 + $0x70] sm:$0xff] }
 0x269   :  { %1619 = vmatpush.bf16.msrb.mxu3 %v2858_v43  ;;  %v3235_v43 = vld [vmem:[#allocation3 + $0x514] sm:$0xf0] }
 0x26a   :  { %1632 = vmatpush.bf16.msra.mxu0 %v2798_v1  ;;  %v2762_v45 = vor.u32 %v3235_v43, %v2761_v42  ;;  %v2996_v1 = vld [vmem:[#allocation3 + $0x6e8] sm:$0xf0]  ;;  %v2978_v42 = vld [vmem:[#allocation3 + $0x6c0] sm:$0xf] }
 0x26c   :  { %1646 = vmatpush.bf16.msra.mxu1 %v2854_v57  ;;  %v3294_v57 = vld [vmem:[#allocation3 + $0x6f4] sm:$0xf] }
 0x26d   :  { %1620 = vmatpush.bf16.msrb.mxu3 %v2850_v56  ;;  %v3295_v56 = vld [vmem:[#allocation3 + $0x6f4] sm:$0xf0]  ;;  %v3007_v63 = vor.u32 %v3294_v57, %v3004_v59  ;;  %v2972_v59 = vld [vmem:[#allocation3 + $0x6b8] sm:$0xf0] }
 0x26e   :  { %1633 = vmatpush.bf16.msra.mxu0 %v2790_v11  ;;  %v3003_v58 = vor.u32 %v3295_v56, %v3002_v55  ;;  %v3287_v55 = vld [vmem:[#allocation3 + $0x6b4] sm:$0xf0] }
 0x26f   :  { %v2971_v57 = vor.u32 %v3287_v55, %v2970_v54 }
 0x270   :  { %1647 = vmatpush.bf16.msra.mxu1 %v2846_v5  ;;  %v3278_v5 = vld [vmem:[#allocation3 + $0x674] sm:$0xf] }
 0x271   :  { %1621 = vmatpush.bf16.msrb.mxu3 %v2842_v2  ;;  %v2938_v2 = vld [vmem:[#allocation3 + $0x670] sm:$0xf] }
 0x272   :  { %v2939_v8 = vor.u32 %v3279_v4, %v2938_v2  ;;  %v3285_v4 = vld [vmem:[#allocation3 + $0x6a4] sm:$0xf0] }
 0x274   :  { %1648 = vmatpush.bf16.msra.mxu1 %v2838_v17 }
 0x275   :  { %1622 = vmatpush.bf16.msrb.mxu3 %v2834_v15 }
 0x2d2   :  { %v1132_v7 = vpop.f32.mrf.mxu1 }
 0x2d8   :  { %v1106_v20 = vpop.f32.mrf.mxu3  ;;  %v1119_v21 = vpop.f32.mrf.mxu0 }
 0x2d9   :  { %v1120_v22 = vadd.f32 %v1119_v21, %v921_v19  ;;  %v3239_v19 = vld [vmem:[#allocation3 + $0x534] sm:$0xf0] }
 0x2da   :  { %v1134_v23 = vpop.f32.mrf.mxu1  ;;  %v2778_v21 = vor.u32 %v3239_v19, %v2777_v18 }
 0x2db   :  { %v1133_v24 = vadd.f32 %v1132_v7, %v1120_v22  ;;  %v3241_v7 = vld [vmem:[#allocation3 + $0x544] sm:$0xf0]  ;;  %v2779_v22 = vld [vmem:[#allocation3 + $0x538] sm:$0xf0] }
 0x2dc   :  { %v2786_v9 = vor.u32 %v3241_v7, %v2785_v6  ;;  %v2940_v6 = vld [vmem:[#allocation3 + $0x678] sm:$0xf0]  ;;  %v2999_v7 = vor.u32 %v3292_v0, %v2996_v1  ;;  %v2916_v1 = vld [vmem:[#allocation3 + $0x648] sm:$0xf0] }
 0x2dd   :  { %v1137_v26 = vpack.c.bf16 %v1133_v24, %v1133_v24  ;;  %v2825_v24 = vld [vmem:[#allocation3 + $0x590] sm:$0xf] }
 0x2de   :  { %v1093_v27 = vpop.f32.mrf.mxu2  ;;  %1607 = vmatpush.bf16.msrb.mxu2 %v2786_v9  ;;  %v2943_v9 = vor.u32 %v3278_v5, %v2940_v6  ;;  %v3284_v5 = vld [vmem:[#allocation3 + $0x6a4] sm:$0xf] }
 0x2df   :  { %v1139_v28 = vunpack.c.l.bf16 %v1137_v26  ;;  %v1094_v29 = vadd.f32 %v1093_v27, %v920_v25  ;;  %v3251_v25 = vld [vmem:[#allocation3 + $0x594] sm:$0xf0]  ;;  %v3250_v26 = vld [vmem:[#allocation3 + $0x594] sm:$0xf] }
 0x2e0   :  { %v1108_v30 = vpop.f32.mrf.mxu3  ;;  %v1121_v31 = vpop.f32.mrf.mxu0  ;;  %v2826_v27 = vor.u32 %v3251_v25, %v2825_v24 }
 0x2e1   :  { %3333 = vtanh.f32 %v1139_v28  ;;  %v1107_v32 = vadd.f32 %v1106_v20, %v1094_v29  ;;  %v3238_v20 = vld [vmem:[#allocation3 + $0x534] sm:$0xf]  ;;  %v2827_v28 = vld [vmem:[#allocation3 + $0x598] sm:$0xf0]  ;;  %v2769_v30 = vld [vmem:[#allocation3 + $0x520] sm:$0xf] }
 0x2e2   :  { %v2782_v23 = vor.u32 %v3238_v20, %v2779_v22  ;;  %1608 = vmatpush.bf16.msrb.mxu2 %v2778_v21  ;;  %v2830_v29 = vor.u32 %v3250_v26, %v2827_v28  ;;  %v3237_v31 = vld [vmem:[#allocation3 + $0x524] sm:$0xf0]  ;;  %1623 = vmatpush.bf16.msrb.mxu3 %v2826_v27 }
 0x2e3   :  { %v1136_v33 = vpack.c.bf16 %v1107_v32, %v1107_v32  ;;  %v3236_v32 = vld [vmem:[#allocation3 + $0x524] sm:$0xf] }
 0x2e4   :  { %1634 = vmatpush.bf16.msra.mxu0 %v2782_v23  ;;  %1649 = vmatpush.bf16.msra.mxu1 %v2830_v29 }
 0x2e5   :  { %v1138_v34 = vunpack.c.l.bf16 %v1136_v33  ;;  %v2770_v33 = vor.u32 %v3237_v31, %v2769_v30  ;;  %v2986_v31 = vld [vmem:[#allocation3 + $0x6d0] sm:$0xf] }
 0x2e6   :  { %v1095_v35 = vpop.f32.mrf.mxu2 }
 0x2e7   :  { %v3334_v36 = vpop.eup %3333  ;;  %3335 = vtanh.f32 %v1138_v34  ;;  %v2771_v34 = vld [vmem:[#allocation3 + $0x528] sm:$0xf0]  ;;  %1609 = vmatpush.bf16.msrb.mxu2 %v2770_v33  ;;  %v3290_v33 = vld [vmem:[#allocation3 + $0x6d4] sm:$0xf] }
 0x2e8   :  { %v1143_v37 = vpack.c.bf16 %v3334_v36, %v3334_v36  ;;  %v2774_v35 = vor.u32 %v3236_v32, %v2771_v34  ;;  %v2817_v36 = vld [vmem:[#allocation3 + $0x580] sm:$0xf]  ;;  %v3291_v32 = vld [vmem:[#allocation3 + $0x6d4] sm:$0xf0] }
 0x2e9   :  { %v2987_v34 = vor.u32 %v3291_v32, %v2986_v31  ;;  %v2948_v31 = vld [vmem:[#allocation3 + $0x688] sm:$0xf0] }
 0x2ea   :  { %1365 = vmatmul.bf16.vlgmr.msra.gmra.mxu3 %v1143_v37  ;;  %1391 = vmatmul.bf16.vlgmr.msrb.gmra.mxu1 %v1143_v37  ;;  %v3249_v37 = vld [vmem:[#allocation3 + $0x584] sm:$0xf0] }
 0x2eb   :  { %1635 = vmatpush.bf16.msra.mxu0 %v2774_v35  ;;  %1610 = vmatpush.bf16.msrb.mxu2 %v2762_v45  ;;  %v2988_v35 = vld [vmem:[#allocation3 + $0x6d8] sm:$0xf0]  ;;  %v3288_v45 = vld [vmem:[#allocation3 + $0x6c4] sm:$0xf] }
 0x2ec   :  { %v2983_v48 = vor.u32 %v3288_v45, %v2980_v46  ;;  %v3311_v45 = vld [vmem:[%s3548_s4 + $0x78] sm:$0xff] }
 0x2ed   :  { %v3336_v38 = vpop.eup %3335  ;;  %v3303_v46 = vld [vmem:[%s3548_s4 + $0x38] sm:$0xff] }
 0x2ee   :  { %v1142_v39 = vpack.c.bf16 %v3336_v38, %v3336_v38  ;;  %v3248_v38 = vld [vmem:[#allocation3 + $0x584] sm:$0xf] }
 0x2ef   :  { %v2822_v41 = vor.u32 %v3248_v38, %v2819_v40  ;;  %1636 = vmatpush.bf16.msra.mxu0 %v2766_v47  ;;  %1611 = vmatpush.bf16.msrb.mxu2 %v2754_v51  ;;  %v2991_v38 = vor.u32 %v3290_v33, %v2988_v35  ;;  %v3276_v40 = vld [vmem:[#allocation3 + $0x664] sm:$0xf]  ;;  %v2979_v47 = vor.u32 %v3289_v44, %v2978_v42  ;;  %v3274_v51 = vld [vmem:[#allocation3 + $0x654] sm:$0xf]  ;;  %v2890_v33 = vld [vmem:[#allocation3 + $0x610] sm:$0xf] }
 0x2f0   :  { %1352 = vmatmul.bf16.vlgmr.msra.gmra.mxu2 %v1142_v39  ;;  %1378 = vmatmul.bf16.vlgmr.msrb.gmra.mxu0 %v1142_v39  ;;  %v2818_v39 = vor.u32 %v3249_v37, %v2817_v36  ;;  %v2930_v36 = vld [vmem:[#allocation3 + $0x660] sm:$0xf]  ;;  %v3277_v37 = vld [vmem:[#allocation3 + $0x664] sm:$0xf0]  ;;  %v3266_v35 = vld [vmem:[#allocation3 + $0x614] sm:$0xf] }
 0x2f1   :  { %1650 = vmatpush.bf16.msra.mxu1 %v2822_v41  ;;  %v2932_v41 = vld [vmem:[#allocation3 + $0x668] sm:$0xf0] }
 0x2f2   :  { %1624 = vmatpush.bf16.msrb.mxu3 %v2818_v39  ;;  %v2931_v39 = vor.u32 %v3277_v37, %v2930_v36  ;;  %v2935_v43 = vor.u32 %v3276_v40, %v2932_v41  ;;  %v2892_v37 = vld [vmem:[#allocation3 + $0x618] sm:$0xf0]  ;;  %v3265_v40 = vld [vmem:[#allocation3 + $0x604] sm:$0xf0]  ;;  %v3264_v41 = vld [vmem:[#allocation3 + $0x604] sm:$0xf] }
 0x2f3   :  { %1637 = vmatpush.bf16.msra.mxu0 %v2758_v53  ;;  %1864 = vmatpush.bf16.msra.mxu2 %v2939_v8  ;;  %v2924_v53 = vld [vmem:[#allocation3 + $0x658] sm:$0xf0] }
 0x2f4   :  { %v2927_v56 = vor.u32 %v3274_v51, %v2924_v53 }
 0x2f5   :  { %1903 = vmatpush.bf16.msrb.mxu1 %v3007_v63  ;;  %v3272_v63 = vld [vmem:[#allocation3 + $0x644] sm:$0xf] }
 0x2f6   :  { %1877 = vmatpush.bf16.msra.mxu3 %v3003_v58  ;;  %v3286_v58 = vld [vmem:[#allocation3 + $0x6b4] sm:$0xf]  ;;  %v2919_v2 = vor.u32 %v3272_v63, %v2916_v1 }
 0x2f7   :  { %1890 = vmatpush.bf16.msrb.mxu0 %v2943_v9  ;;  %1865 = vmatpush.bf16.msra.mxu2 %v2931_v39  ;;  %v2975_v60 = vor.u32 %v3286_v58, %v2972_v59  ;;  %v2906_v9 = vld [vmem:[#allocation3 + $0x630] sm:$0xf]  ;;  %v2882_v39 = vld [vmem:[#allocation3 + $0x600] sm:$0xf] }
 0x2f8   :  { %v2883_v42 = vor.u32 %v3265_v40, %v2882_v39 }
 0x2f9   :  { %1904 = vmatpush.bf16.msrb.mxu1 %v2999_v7  ;;  %v2964_v7 = vld [vmem:[#allocation3 + $0x6a8] sm:$0xf0] }
 0x2fa   :  { %1878 = vmatpush.bf16.msra.mxu3 %v2995_v3  ;;  %v2962_v3 = vld [vmem:[#allocation3 + $0x6a0] sm:$0xf]  ;;  %v2967_v8 = vor.u32 %v3284_v5, %v2964_v7  ;;  %v3309_v7 = vld [vmem:[%s3548_s4 + $0x68] sm:$0xff] }
 0x2fb   :  { %1891 = vmatpush.bf16.msrb.mxu0 %v2935_v43  ;;  %1866 = vmatpush.bf16.msra.mxu2 %v2923_v52  ;;  %v2963_v6 = vor.u32 %v3285_v4, %v2962_v3  ;;  %v2884_v43 = vld [vmem:[#allocation3 + $0x608] sm:$0xf0] }
 0x2fc   :  { %v2887_v44 = vor.u32 %v3264_v41, %v2884_v43 }
 0x2fd   :  { %1905 = vmatpush.bf16.msrb.mxu1 %v2991_v38  ;;  %v2895_v38 = vor.u32 %v3266_v35, %v2892_v37 }
 0x2fe   :  { %1879 = vmatpush.bf16.msra.mxu3 %v2987_v34  ;;  %v3267_v34 = vld [vmem:[#allocation3 + $0x614] sm:$0xf0] }
 0x2ff   :  { %1892 = vmatpush.bf16.msrb.mxu0 %v2927_v56  ;;  %v2891_v36 = vor.u32 %v3267_v34, %v2890_v33 }
 0x301   :  { %1906 = vmatpush.bf16.msrb.mxu1 %v2983_v48  ;;  %v2750_v48 = vld [vmem:[%s3549_s5 + $0x6] ss:$8 sm:$0x3] }
 0x302   :  { %1880 = vmatpush.bf16.msra.mxu3 %v2979_v47  ;;  %v1441_v50 = vperm.slane %v2750_v48, 1  ;;  %v1440_v56 = vperm.slane %v2750_v48, 0 }
 0x303   :  { %1893 = vmatpush.bf16.msrb.mxu0 %v2919_v2 }
 0x305   :  { %1907 = vmatpush.bf16.msrb.mxu1 %v2975_v60 }
 0x306   :  { %1881 = vmatpush.bf16.msra.mxu3 %v2971_v57 }
 0x309   :  { %1908 = vmatpush.bf16.msrb.mxu1 %v2967_v8  ;;  %v3302_v8 = vld [vmem:[%s3548_s4 + $0x30] sm:$0xff] }
 0x30a   :  { %1882 = vmatpush.bf16.msra.mxu3 %v2963_v6 }
 0x367   :  { %v1392_v62 = vpop.f32.mrf.mxu1 }
 0x36d   :  { %v1366_v11 = vpop.f32.mrf.mxu3  ;;  %v1379_v12 = vpop.f32.mrf.mxu0 }
 0x36e   :  { %v1380_v13 = vadd.f32 %v1379_v12, %v1181_v10  ;;  %v3271_v10 = vld [vmem:[#allocation3 + $0x634] sm:$0xf0] }
 0x36f   :  { %v1394_v14 = vpop.f32.mrf.mxu1  ;;  %v2907_v12 = vor.u32 %v3271_v10, %v2906_v9  ;;  %v3308_v9 = vld [vmem:[%s3548_s4 + $0x60] sm:$0xff]  ;;  %v3301_v10 = vld [vmem:[%s3548_s4 + $0x28] sm:$0xff] }
 0x370   :  { %v1393_v15 = vadd.f32 %v1392_v62, %v1380_v13  ;;  %v3273_v62 = vld [vmem:[#allocation3 + $0x644] sm:$0xf0]  ;;  %v2908_v13 = vld [vmem:[#allocation3 + $0x638] sm:$0xf0] }
 0x371   :  { %v2915_v0 = vor.u32 %v3273_v62, %v2914_v61 }
 0x372   :  { %v1397_v17 = vpack.c.bf16 %v1393_v15, %v1393_v15  ;;  %v2954_v15 = vld [vmem:[#allocation3 + $0x690] sm:$0xf] }
 0x373   :  { %v1353_v18 = vpop.f32.mrf.mxu2  ;;  %1867 = vmatpush.bf16.msra.mxu2 %v2915_v0 }
 0x374   :  { %v1399_v19 = vunpack.c.l.bf16 %v1397_v17  ;;  %v1354_v20 = vadd.f32 %v1353_v18, %v1180_v16  ;;  %v3283_v16 = vld [vmem:[#allocation3 + $0x694] sm:$0xf0]  ;;  %v3282_v17 = vld [vmem:[#allocation3 + $0x694] sm:$0xf] }
 0x375   :  { %v1368_v21 = vpop.f32.mrf.mxu3  ;;  %v1381_v22 = vpop.f32.mrf.mxu0  ;;  %v2955_v18 = vor.u32 %v3283_v16, %v2954_v15  ;;  %v3305_v15 = vld [vmem:[%s3548_s4 + $0x48] sm:$0xff]  ;;  %v3298_v16 = vld [vmem:[%s3548_s4 + $0x10] sm:$0xff] }
 0x376   :  { %3337 = vtanh.f32 %v1399_v19  ;;  %v1367_v23 = vadd.f32 %v1366_v11, %v1354_v20  ;;  %v3270_v11 = vld [vmem:[#allocation3 + $0x634] sm:$0xf]  ;;  %v2956_v19 = vld [vmem:[#allocation3 + $0x698] sm:$0xf0]  ;;  %v2898_v21 = vld [vmem:[#allocation3 + $0x620] sm:$0xf] }
 0x377   :  { %v2911_v14 = vor.u32 %v3270_v11, %v2908_v13  ;;  %1868 = vmatpush.bf16.msra.mxu2 %v2907_v12  ;;  %v2959_v20 = vor.u32 %v3282_v17, %v2956_v19  ;;  %v3269_v22 = vld [vmem:[#allocation3 + $0x624] sm:$0xf0]  ;;  %1883 = vmatpush.bf16.msra.mxu3 %v2955_v18  ;;  %v3307_v11 = vld [vmem:[%s3548_s4 + $0x58] sm:$0xff]  ;;  %v3300_v12 = vld [vmem:[%s3548_s4 + $0x20] sm:$0xff] }
 0x378   :  { %v1396_v24 = vpack.c.bf16 %v1367_v23, %v1367_v23  ;;  %v3268_v23 = vld [vmem:[#allocation3 + $0x624] sm:$0xf]  ;;  %v3306_v13 = vld [vmem:[%s3548_s4 + $0x50] sm:$0xff]  ;;  %v3297_v18 = vld [vmem:[%s3548_s4 + $0x8] sm:$0xff] }
 0x379   :  { %1894 = vmatpush.bf16.msrb.mxu0 %v2911_v14  ;;  %1909 = vmatpush.bf16.msrb.mxu1 %v2959_v20  ;;  %v3299_v14 = vld [vmem:[%s3548_s4 + $0x18] sm:$0xff]  ;;  %v3304_v17 = vld [vmem:[%s3548_s4 + $0x40] sm:$0xff] }
 0x37a   :  { %v1398_v25 = vunpack.c.l.bf16 %v1396_v24  ;;  %v2899_v24 = vor.u32 %v3269_v22, %v2898_v21  ;;  %v3296_v19 = vld [vmem:[%s3548_s4] sm:$0xff] }
 0x37b   :  { %v1355_v26 = vpop.f32.mrf.mxu2  ;;  %v2879_v21 = vld [vmem:[%s3549_s5 + $0x7] ss:$8 sm:$0x3] }
 0x37c   :  { %v3338_v27 = vpop.eup %3337  ;;  %3339 = vtanh.f32 %v1398_v25  ;;  %v2900_v25 = vld [vmem:[#allocation3 + $0x628] sm:$0xf0]  ;;  %1869 = vmatpush.bf16.msra.mxu2 %v2899_v24  ;;  %v1701_v22 = vperm.slane %v2879_v21, 1 }
 0x37d   :  { %v1403_v28 = vpack.c.bf16 %v3338_v27, %v3338_v27  ;;  %v2903_v26 = vor.u32 %v3268_v23, %v2900_v25  ;;  %v2946_v27 = vld [vmem:[#allocation3 + $0x680] sm:$0xf] }
 0x37f   :  { %1625 = vmatmul.bf16.vlgmr.msrb.gmra.mxu3 %v1403_v28  ;;  %1651 = vmatmul.bf16.vlgmr.msra.gmra.mxu1 %v1403_v28  ;;  %v3281_v28 = vld [vmem:[#allocation3 + $0x684] sm:$0xf0] }
 0x380   :  { %1895 = vmatpush.bf16.msrb.mxu0 %v2903_v26  ;;  %1870 = vmatpush.bf16.msra.mxu2 %v2891_v36 }
 0x382   :  { %v3340_v29 = vpop.eup %3339 }
 0x383   :  { %v1402_v30 = vpack.c.bf16 %v3340_v29, %v3340_v29  ;;  %v3280_v29 = vld [vmem:[#allocation3 + $0x684] sm:$0xf] }
 0x384   :  { %v2951_v32 = vor.u32 %v3280_v29, %v2948_v31  ;;  %1896 = vmatpush.bf16.msrb.mxu0 %v2895_v38  ;;  %1871 = vmatpush.bf16.msra.mxu2 %v2883_v42 }
 0x385   :  { %1612 = vmatmul.bf16.vlgmr.msrb.gmra.mxu2 %v1402_v30  ;;  %1638 = vmatmul.bf16.vlgmr.msra.gmra.mxu0 %v1402_v30  ;;  %v2947_v30 = vor.u32 %v3281_v28, %v2946_v27  ;;  %v1700_v28 = vperm.slane %v2879_v21, 0 }
 0x386   :  { %1910 = vmatpush.bf16.msrb.mxu1 %v2951_v32 }
 0x387   :  { %1884 = vmatpush.bf16.msra.mxu3 %v2947_v30 }
 0x388   :  { %1897 = vmatpush.bf16.msrb.mxu0 %v2887_v44  ;;  %2056 = vmatpush.bf16.msrb.mxu2 %v3303_v46  ;;  %v3316_v44 = vld [vmem:[%s3550_s6] ss:$0 sm:$0xff] }
 0x38b   :  { %2069 = vmatpush.bf16.msrb.mxu3 %v3311_v45 }
 0x38c   :  { %2057 = vmatpush.bf16.msrb.mxu2 %v3302_v8 }
 0x38f   :  { %2070 = vmatpush.bf16.msrb.mxu3 %v3310_v49 }
 0x390   :  { %2058 = vmatpush.bf16.msrb.mxu2 %v3301_v10 }
 0x393   :  { %2071 = vmatpush.bf16.msrb.mxu3 %v3309_v7 }
 0x394   :  { %2059 = vmatpush.bf16.msrb.mxu2 %v3300_v12 }
 0x397   :  { %2072 = vmatpush.bf16.msrb.mxu3 %v3308_v9 }
 0x398   :  { %2060 = vmatpush.bf16.msrb.mxu2 %v3299_v14 }
 0x39b   :  { %2073 = vmatpush.bf16.msrb.mxu3 %v3307_v11 }
 0x39c   :  { %2061 = vmatpush.bf16.msrb.mxu2 %v3298_v16 }
 0x39f   :  { %2074 = vmatpush.bf16.msrb.mxu3 %v3306_v13 }
 0x3a0   :  { %2062 = vmatpush.bf16.msrb.mxu2 %v3297_v18 }
 0x3a3   :  { %2075 = vmatpush.bf16.msrb.mxu3 %v3305_v15 }
 0x3a4   :  { %2063 = vmatpush.bf16.msrb.mxu2 %v3296_v19 }
 0x3a7   :  { %2076 = vmatpush.bf16.msrb.mxu3 %v3304_v17 }
 0x3fc   :  { %v1652_v47 = vpop.f32.mrf.mxu1 }
 0x402   :  { %v1626_v51 = vpop.f32.mrf.mxu3  ;;  %v1639_v52 = vpop.f32.mrf.mxu0 }
 0x403   :  { %v1640_v53 = vadd.f32 %v1639_v52, %v1441_v50 }
 0x404   :  { %v1654_v54 = vpop.f32.mrf.mxu1 }
 0x405   :  { %v1653_v55 = vadd.f32 %v1652_v47, %v1640_v53  ;;  %v2082_v47 = vstv %s3544_s0 }
 0x407   :  { %v1657_v57 = vpack.c.bf16 %v1653_v55, %v1653_v55 }
 0x408   :  { %v1613_v58 = vpop.f32.mrf.mxu2 }
 0x409   :  { %v1659_v59 = vunpack.c.l.bf16 %v1657_v57  ;;  %v1614_v60 = vadd.f32 %v1613_v58, %v1440_v56 }
 0x40a   :  { %v1628_v61 = vpop.f32.mrf.mxu3  ;;  %v1641_v62 = vpop.f32.mrf.mxu0 }
 0x40b   :  { %3341 = vtanh.f32 %v1659_v59  ;;  %v1627_v63 = vadd.f32 %v1626_v51, %v1614_v60  ;;  %v3349_v51 = vld [vmem:[%s3545_s1] sm:$0xff] }
 0x40d   :  { %v1656_v0 = vpack.c.bf16 %v1627_v63, %v1627_v63 }
 0x40f   :  { %v1658_v1 = vunpack.c.l.bf16 %v1656_v0 }
 0x410   :  { %v1615_v2 = vpop.f32.mrf.mxu2 }
 0x411   :  { %v3342_v3 = vpop.eup %3341  ;;  %3343 = vtanh.f32 %v1658_v1 }
 0x412   :  { %v1663_v4 = vpack.c.bf16 %v3342_v3, %v3342_v3 }
 0x414   :  { %1885 = vmatmul.bf16.vlgmr.msra.gmra.mxu3 %v1663_v4  ;;  %1911 = vmatmul.bf16.vlgmr.msrb.gmra.mxu1 %v1663_v4 }
 0x417   :  { %v3344_v5 = vpop.eup %3343 }
 0x418   :  { %v1662_v6 = vpack.c.bf16 %v3344_v5, %v3344_v5 }
 0x41a   :  { %1872 = vmatmul.bf16.vlgmr.msra.gmra.mxu2 %v1662_v6  ;;  %1898 = vmatmul.bf16.vlgmr.msrb.gmra.mxu0 %v1662_v6 }
 0x491   :  { %v1912_v20 = vpop.f32.mrf.mxu1 }
 0x497   :  { %v1886_v23 = vpop.f32.mrf.mxu3  ;;  %v1899_v24 = vpop.f32.mrf.mxu0 }
 0x498   :  { %v1900_v25 = vadd.f32 %v1899_v24, %v1701_v22 }
 0x499   :  { %v1914_v26 = vpop.f32.mrf.mxu1 }
 0x49a   :  { %v1913_v27 = vadd.f32 %v1912_v20, %v1900_v25 }
 0x49c   :  { %v1917_v29 = vpack.c.bf16 %v1913_v27, %v1913_v27 }
 0x49d   :  { %v1873_v30 = vpop.f32.mrf.mxu2 }
 0x49e   :  { %v1919_v31 = vunpack.c.l.bf16 %v1917_v29  ;;  %v1874_v32 = vadd.f32 %v1873_v30, %v1700_v28 }
 0x49f   :  { %v1888_v33 = vpop.f32.mrf.mxu3  ;;  %v1901_v34 = vpop.f32.mrf.mxu0 }
 0x4a0   :  { %3345 = vtanh.f32 %v1919_v31  ;;  %v1887_v35 = vadd.f32 %v1886_v23, %v1874_v32 }
 0x4a2   :  { %v1916_v36 = vpack.c.bf16 %v1887_v35, %v1887_v35 }
 0x4a4   :  { %v1918_v37 = vunpack.c.l.bf16 %v1916_v36 }
 0x4a5   :  { %v1875_v38 = vpop.f32.mrf.mxu2 }
 0x4a6   :  { %v3346_v39 = vpop.eup %3345  ;;  %3347 = vtanh.f32 %v1918_v37 }
 0x4a7   :  { %v1923_v40 = vpack.c.bf16 %v3346_v39, %v3346_v39 }
 0x4a9   :  { %2077 = vmatmul.bf16.vlgmr.msrb.gmra.mxu3 %v1923_v40 }
 0x4ac   :  { %v3348_v41 = vpop.eup %3347 }
 0x4ad   :  { %v1922_v42 = vpack.c.bf16 %v3348_v41, %v3348_v41 }
 0x4af   :  { %2064 = vmatmul.bf16.vlgmr.msrb.gmra.mxu2 %v1922_v42 }
 0x52c   :  { %v2078_v43 = vpop.f32.mrf.mxu3 }
 0x532   :  { %v2065_v45 = vpop.f32.mrf.mxu2 }
 0x533   :  { %v2066_v46 = vadd.f32 %v3316_v44, %v2065_v45 }
 0x534   :  { %v2080_v48 = vpop.f32.mrf.mxu3 }
 0x535   :  { %v2079_v49 = vadd.f32 %v2078_v43, %v2066_v46 }
 0x537   :  { %v2083_v50 = vmul.f32 %v2082_v47, %v2079_v49 }
 0x539   :  { %v2084_v52 = vadd.f32 %v3349_v51, %v2083_v50 }
 0x53a   :  { %v2067_v53 = vpop.f32.mrf.mxu2 }
 0x53b   :  { %2085 = vst.msk [vmem:[#allocation6] sm:$0xff] %vm60_vm1, %v2084_v52 }
 0x53c   :  { %2096 = dma.vmem_to_hbm [thread:$0]  %s2092_s3, 128, %s2094_s14, [#allocation5]  }
 0x53d   :  { %3400 = dma.done.wait [#allocation5], 128  }
 0x53e   :  { %3401 = vsyncadd [#allocation5], 4294967168 }
 0x53f   :  { %2101 = vsyncpa [#allocation4], 1 }
 0x540   :  { %2102 = vsyncpa [#allocation5], 1 }

</bundles_post_ra>
